<compile_context>
chip_gen: v6e
topology: v6e:2x2x1
jax: 0.10.0
libtpu: 0.0.40
codegen_flags: <defaults>
</compile_context>

<pallas_src>
import functools
import math

import jax
import jax.numpy as jnp
from jax import lax
from jax.experimental import pallas as pl
from jax.experimental.pallas import tpu as pltpu

# ----------------------- synthetic model config -----------------------------
CONF_THR = 0.30
IOU_THR = 0.50
MAX_OUT = 16
NUM_CLASSES = 3
NUM_ANCHORS = 2
INPUT_SIZE = (16, 16)
IN_CH = 4
FEAT_CH = 8
LEVEL_STRIDES = (2, 4)               # -> FPN spatials 8x8 (s=64) and 4x4 (s=16)
ANCHOR_SCALES = (1.0, 1.5)           # anchor side = scale * stride (square)
BBOX_CLIP = math.log(1000.0 / 16.0)  # standard RetinaNet dw/dh clamp


# ----------------------- fused Pallas kernel ---------------------------------
def _fused_kernel(x_ref, wp_ref, bp_ref, wh_ref, bh_ref, anc_ref,
                  heads_ref, dets_ref, cand_ref, *,
                  conf_thr, iou_thr, strides, anchor_scales, level_cols,
                  batch, num_classes, num_anchors, max_out, npad):
    # ---- fused 1x1-conv heads: channel-leading GEMMs (lanes = B*H*W) --------
    feat = jnp.dot(wp_ref[...], x_ref[...],
                   preferred_element_type=jnp.float32) + bp_ref[...]
    feat = jnp.maximum(feat, 0.0)                                 # [F, M] ReLU
    heads = jnp.dot(wh_ref[...], feat,
                    preferred_element_type=jnp.float32) + bh_ref[...]
    heads_ref[...] = heads          # raw model outputs, lane-dense [14, 160]

    # ---- candidate slab: row0=score(-inf pad), 1=cat, 2=batch, 3..6=box -----
    rid = lax.broadcasted_iota(jnp.int32, (8, npad), 0)
    cand_ref[...] = jnp.where(rid == 0, -jnp.inf, 0.0).astype(jnp.float32)

    nck = num_anchors * num_classes
    in_off = 0       # column offset into the level-concatenated head outputs
    out_off = 0      # column offset into the candidate slab
    for lvl, stride in enumerate(strides):
        m_cols = level_cols[lvl]
        per_b = m_cols // batch
        lane_l = lax.broadcasted_iota(jnp.int32, (1, m_cols), 1).astype(jnp.float32)
        batch_f = jnp.floor(lane_l * (1.0 / per_b))       # batch id per column
        cxa = anc_ref[0:1, in_off:in_off + m_cols]        # anchor centers (const)
        cya = anc_ref[1:2, in_off:in_off + m_cols]

        for a in range(num_anchors):
            logit_a = heads_ref[a * num_classes:(a + 1) * num_classes,
                                in_off:in_off + m_cols]   # [K, M]
            sa = 1.0 / (1.0 + jnp.exp(-logit_a))          # sigmoid
            smax = jnp.max(sa, axis=0, keepdims=True)     # [1, M] max over classes
            valid = smax >= conf_thr                      # == any(score >= thr)
            kidx = lax.broadcasted_iota(jnp.int32, sa.shape, 0).astype(jnp.float32)
            cat = jnp.min(jnp.where(sa == smax, kidx, float(num_classes)),
                          axis=0, keepdims=True)          # first argmax class

            base = nck + 4 * a
            dx = heads_ref[base + 0:base + 1, in_off:in_off + m_cols]
            dy = heads_ref[base + 1:base + 2, in_off:in_off + m_cols]
            dw = heads_ref[base + 2:base + 3, in_off:in_off + m_cols]
            dh = heads_ref[base + 3:base + 4, in_off:in_off + m_cols]
            size = float(anchor_scales[a] * stride)       # square anchors: wa == ha
            cx = cxa + dx * size
            cy = cya + dy * size
            # clamp dw/dh (standard RetinaNet) so exp() stays finite for NMS
            w = size * jnp.exp(jnp.minimum(dw, BBOX_CLIP))
            h = size * jnp.exp(jnp.minimum(dh, BBOX_CLIP))

            sl = slice(out_off, out_off + m_cols)
            cand_ref[0:1, sl] = jnp.where(valid, smax, -jnp.inf)
            cand_ref[1:2, sl] = cat
            cand_ref[2:3, sl] = batch_f
            cand_ref[3:4, sl] = cx - 0.5 * w
            cand_ref[4:5, sl] = cy - 0.5 * h
            cand_ref[5:6, sl] = cx + 0.5 * w
            cand_ref[6:7, sl] = cy + 0.5 * h
            out_off += m_cols
        in_off += m_cols

    # ---- greedy class-/batch-aware NMS, fully VMEM-resident ------------------
    sc0 = cand_ref[0:1, :]
    cats = cand_ref[1:2, :]
    bidx = cand_ref[2:3, :]
    bx1 = cand_ref[3:4, :]
    by1 = cand_ref[4:5, :]
    bx2 = cand_ref[5:6, :]
    by2 = cand_ref[6:7, :]
    areas = (bx2 - bx1) * (by2 - by1)
    lane_f = lax.broadcasted_iota(jnp.int32, (1, npad), 1).astype(jnp.float32)
    col8 = lax.broadcasted_iota(jnp.int32, (max_out, 8), 1)
    row8 = lax.broadcasted_iota(jnp.int32, (max_out, 8), 0)

    def body(i, carry):
        sc, dets = carry
        m = jnp.max(sc, keepdims=True)                                   # [1,1]
        best = jnp.min(jnp.where(sc == m, lane_f, float(npad)), keepdims=True)
        sel = lane_f == best                                             # [1,npad]
        keep = m > -jnp.inf                                              # [1,1]

        def pick(v):  # gather the selected candidate's attribute (masked sum)
            return jnp.sum(jnp.where(sel, v, 0.0), keepdims=True)

        x1b, y1b = pick(bx1), pick(by1)
        x2b, y2b = pick(bx2), pick(by2)
        catb, batb = pick(cats), pick(bidx)
        area_b = (x2b - x1b) * (y2b - y1b)

        xx1 = jnp.maximum(x1b, bx1)
        yy1 = jnp.maximum(y1b, by1)
        xx2 = jnp.minimum(x2b, bx2)
        yy2 = jnp.minimum(y2b, by2)
        inter = jnp.maximum(xx2 - xx1, 0.0) * jnp.maximum(yy2 - yy1, 0.0)
        iou = inter / jnp.maximum(area_b + areas - inter, 1e-9)
        same = (cats == catb) & (bidx == batb)            # class- & batch-aware
        suppress = ((iou >= iou_thr) & same) | sel
        sc_new = jnp.where(keep & suppress, -jnp.inf, sc)

        row = (jnp.where(col8 == 0, batb, 0.0)
               + jnp.where(col8 == 1, x1b, 0.0)
               + jnp.where(col8 == 2, y1b, 0.0)
               + jnp.where(col8 == 3, x2b, 0.0)
               + jnp.where(col8 == 4, y2b, 0.0)
               + jnp.where(col8 == 5, m, 0.0)
               + jnp.where(col8 == 6, catb, 0.0))                        # [max_out,8]
        row = jnp.where(keep, row, jnp.full_like(row, -1.0))
        dets_new = jnp.where(row8 == i, row, dets)
        return sc_new, dets_new

    dets_init = jnp.full((max_out, 8), -1.0, jnp.float32)
    _, dets = lax.fori_loop(0, max_out, body, (sc0, dets_init))
    dets_ref[...] = dets


def fused_forward(xc, wp_t, bp, wh_t, bh, anc, *, batch, level_cols):
    """Single pallas_call: proj+heads GEMMs, post-proc and NMS, VMEM-resident."""
    n_head = NUM_ANCHORS * NUM_CLASSES + 4 * NUM_ANCHORS
    total_cols = xc.shape[1]
    n_cand = NUM_ANCHORS * total_cols
    npad = ((n_cand + 127) // 128) * 128   # lane-aligned candidate slab width

    kernel = functools.partial(
        _fused_kernel,
        conf_thr=CONF_THR, iou_thr=IOU_THR,
        strides=LEVEL_STRIDES, anchor_scales=ANCHOR_SCALES,
        level_cols=level_cols, batch=batch,
        num_classes=NUM_CLASSES, num_anchors=NUM_ANCHORS,
        max_out=MAX_OUT, npad=npad)

    return pl.pallas_call(
        kernel,
        out_shape=(
            jax.ShapeDtypeStruct((n_head, total_cols), jnp.float32),  # raw heads
            jax.ShapeDtypeStruct((MAX_OUT, 8), jnp.float32),          # dets (+pad col)
        ),
        grid=(1,),
        in_specs=[
            pl.BlockSpec(xc.shape, lambda i: (0, 0)),
            pl.BlockSpec(wp_t.shape, lambda i: (0, 0)),
            pl.BlockSpec(bp.shape, lambda i: (0, 0)),
            pl.BlockSpec(wh_t.shape, lambda i: (0, 0)),
            pl.BlockSpec(bh.shape, lambda i: (0, 0)),
            pl.BlockSpec(anc.shape, lambda i: (0, 0)),
        ],
        out_specs=(
            pl.BlockSpec((n_head, total_cols), lambda i: (0, 0)),
            pl.BlockSpec((MAX_OUT, 8), lambda i: (0, 0)),
        ),
        scratch_shapes=[pltpu.VMEM((8, npad), jnp.float32)],
        compiler_params=pltpu.CompilerParams(
            dimension_semantics=("arbitrary",)),
    )(xc, wp_t, bp, wh_t, bh, anc)


# ----------------------- plain-JAX glue --------------------------------------
def init_params(key):
    k1, k2, k3 = jax.random.split(key, 3)
    return {
        "proj_w": 0.1 * jax.random.normal(k1, (IN_CH, FEAT_CH), jnp.float32),
        "proj_b": jnp.zeros((FEAT_CH,), jnp.float32),
        "cls_w": 0.1 * jax.random.normal(k2, (FEAT_CH, NUM_ANCHORS * NUM_CLASSES), jnp.float32),
        "cls_b": jnp.zeros((NUM_ANCHORS * NUM_CLASSES,), jnp.float32),
        "reg_w": 0.1 * jax.random.normal(k3, (FEAT_CH, NUM_ANCHORS * 4), jnp.float32),
        "reg_b": jnp.zeros((NUM_ANCHORS * 4,), jnp.float32),
    }


def make_anchor_center_maps(batch):
    """Anchor-center constants [2, B*sum(Hs*Ws)] (rows = cx, cy), columns ordered
    (level, b, h, w) to match the kernel's channel-leading column layout."""
    cols = []
    for stride in LEVEL_STRIDES:
        hs, ws = INPUT_SIZE[0] // stride, INPUT_SIZE[1] // stride
        ys = (jnp.arange(hs, dtype=jnp.float32) + 0.5) * stride
        xs = (jnp.arange(ws, dtype=jnp.float32) + 0.5) * stride
        cy, cx = jnp.meshgrid(ys, xs, indexing="ij")
        cx = jnp.tile(cx.reshape(-1), (batch,))
        cy = jnp.tile(cy.reshape(-1), (batch,))
        cols.append(jnp.stack([cx, cy], axis=0))
    return jnp.concatenate(cols, axis=1)


def wrapper_forward(params, anchor_maps, x_nchw):
    B, C, H, W = x_nchw.shape

    # avg-pool "backbone": one cheap XLA reduce per level feeding the fused kernel
    # TODO(synk): strided avg-pool left in XLA; not worth a dedicated Pallas kernel.
    feats_t, level_cols = [], []
    for stride in LEVEL_STRIDES:
        hs, ws = H // stride, W // stride
        f = x_nchw.reshape(B, C, hs, stride, ws, stride).mean(axis=(3, 5))  # [B,C,hs,ws]
        feats_t.append(jnp.transpose(f, (1, 0, 2, 3)).reshape(C, B * hs * ws))
        level_cols.append(B * hs * ws)
    xc = jnp.concatenate(feats_t, axis=1)                                    # [C, 160]

    # pack proj / cls / reg weights for the single fused kernel (channel-leading)
    wp_t = params["proj_w"].T                                                # [F, C]
    bp = params["proj_b"].reshape(-1, 1)                                     # [F, 1]
    wh_t = jnp.concatenate([params["cls_w"], params["reg_w"]], axis=1).T     # [14, F]
    bh = jnp.concatenate([params["cls_b"], params["reg_b"]]).reshape(-1, 1)  # [14, 1]

    heads, dets8 = fused_forward(xc, wp_t, bp, wh_t, bh, anchor_maps,
                                 batch=B, level_cols=tuple(level_cols))

    # raw per-level model outputs, NCHW like the PyTorch model
    nck = NUM_ANCHORS * NUM_CLASSES
    logits_nchw, regress_nchw = [], []
    off = 0
    for stride, cols in zip(LEVEL_STRIDES, level_cols):
        hs, ws = H // stride, W // stride
        blk = heads[:, off:off + cols].reshape(-1, B, hs, ws)                # [14,B,hs,ws]
        logits_nchw.append(jnp.transpose(blk[:nck], (1, 0, 2, 3)))
        regress_nchw.append(jnp.transpose(blk[nck:], (1, 0, 2, 3)))
        off += cols

    # TODO(synk): boolean-mask gather / dynamic-size NMS output has no Pallas
    # equivalent; the kernel emits a fixed [MAX_OUT, 7] dets table, -1 padded.
    dets = dets8[:, :7]
    return dets, logits_nchw, regress_nchw


if __name__ == "__main__":
    key = jax.random.PRNGKey(0)
    kp, kx = jax.random.split(key)
    params = init_params(kp)
    x = jax.random.normal(kx, (2, IN_CH, INPUT_SIZE[0], INPUT_SIZE[1]), jnp.float32)  # NCHW
    anchor_maps = make_anchor_center_maps(x.shape[0])

    fwd = jax.jit(wrapper_forward)
    dets, logits_list, regress_list = fwd(params, anchor_maps, x)
    jax.block_until_ready(dets)
    for t in logits_list + regress_list:
        jax.block_until_ready(t)
    print("KERNEL_OK")
</pallas_src>

<mosaic_0001>
module attributes {stable_mosaic.version = 11 : i64} {
  func.func @_fused_kernel(%arg0: i32, %arg1: memref<4x160xf32, #tpu.memory_space<vmem>>, %arg2: memref<8x4xf32, #tpu.memory_space<vmem>>, %arg3: memref<8x1xf32, #tpu.memory_space<vmem>>, %arg4: memref<14x8xf32, #tpu.memory_space<vmem>>, %arg5: memref<14x1xf32, #tpu.memory_space<vmem>>, %arg6: memref<2x160xf32, #tpu.memory_space<vmem>>, %arg7: memref<14x160xf32, #tpu.memory_space<vmem>>, %arg8: memref<16x8xf32, #tpu.memory_space<vmem>>, %arg9: memref<8x384xf32, #tpu.memory_space<vmem>>) attributes {dimension_semantics = [#tpu.dimension_semantics<arbitrary>], iteration_bounds = array<i64: 1>, scalar_prefetch = 0 : i64, scratch_operands = 1 : i64, tpu.core_type = #tpu.core_type<tc>, window_params = [{pipeline_mode = #tpu.pipeline_mode<synchronous>, transform_indices = @transform_0, window_bounds = array<i64: 4, 160>}, {pipeline_mode = #tpu.pipeline_mode<synchronous>, transform_indices = @transform_1, window_bounds = array<i64: 8, 4>}, {pipeline_mode = #tpu.pipeline_mode<synchronous>, transform_indices = @transform_2, window_bounds = array<i64: 8, 1>}, {pipeline_mode = #tpu.pipeline_mode<synchronous>, transform_indices = @transform_3, window_bounds = array<i64: 14, 8>}, {pipeline_mode = #tpu.pipeline_mode<synchronous>, transform_indices = @transform_4, window_bounds = array<i64: 14, 1>}, {pipeline_mode = #tpu.pipeline_mode<synchronous>, transform_indices = @transform_5, window_bounds = array<i64: 2, 160>}, {pipeline_mode = #tpu.pipeline_mode<synchronous>, transform_indices = @transform_6, window_bounds = array<i64: 14, 160>}, {pipeline_mode = #tpu.pipeline_mode<synchronous>, transform_indices = @transform_7, window_bounds = array<i64: 16, 8>}]} {
    %c0 = arith.constant 0 : index
    %c0_0 = arith.constant 0 : index
    %0 = vector.load %arg2[%c0, %c0_0] : memref<8x4xf32, #tpu.memory_space<vmem>>, vector<8x4xf32>
    %c0_1 = arith.constant 0 : index
    %c0_2 = arith.constant 0 : index
    %1 = vector.load %arg1[%c0_1, %c0_2] : memref<4x160xf32, #tpu.memory_space<vmem>>, vector<4x160xf32>
    %cst = arith.constant dense<0.000000e+00> : vector<8x160xf32>
    %2 = tpu.matmul %0, %1, %cst {dimension_numbers = #tpu.dot_dimension_numbers<[1], [0], [0], [1], [0, 0, 1, 1], [], []>} : vector<8x4xf32>, vector<4x160xf32>, vector<8x160xf32> -> vector<8x160xf32>
    %c0_3 = arith.constant 0 : index
    %c0_4 = arith.constant 0 : index
    %3 = vector.load %arg3[%c0_3, %c0_4] : memref<8x1xf32, #tpu.memory_space<vmem>>, vector<8x1xf32>
    %4 = vector.broadcast %3 : vector<8x1xf32> to vector<8x160xf32>
    %5 = arith.addf %2, %4 : vector<8x160xf32>
    %cst_5 = arith.constant 0.000000e+00 : f32
    %6 = vector.broadcast %cst_5 : f32 to vector<8x160xf32>
    %7 = arith.maximumf %5, %6 : vector<8x160xf32>
    %c0_6 = arith.constant 0 : index
    %c0_7 = arith.constant 0 : index
    %8 = vector.load %arg4[%c0_6, %c0_7] : memref<14x8xf32, #tpu.memory_space<vmem>>, vector<14x8xf32>
    %cst_8 = arith.constant dense<0.000000e+00> : vector<14x160xf32>
    %9 = tpu.matmul %8, %7, %cst_8 {dimension_numbers = #tpu.dot_dimension_numbers<[1], [0], [0], [1], [0, 0, 1, 1], [], []>} : vector<14x8xf32>, vector<8x160xf32>, vector<14x160xf32> -> vector<14x160xf32>
    %c0_9 = arith.constant 0 : index
    %c0_10 = arith.constant 0 : index
    %10 = vector.load %arg5[%c0_9, %c0_10] : memref<14x1xf32, #tpu.memory_space<vmem>>, vector<14x1xf32>
    %11 = vector.broadcast %10 : vector<14x1xf32> to vector<14x160xf32>
    %12 = arith.addf %9, %11 : vector<14x160xf32>
    %c0_11 = arith.constant 0 : index
    %c0_12 = arith.constant 0 : index
    %13 = vector.load %arg7[%c0_11, %c0_12] : memref<14x160xf32, #tpu.memory_space<vmem>>, vector<14x160xf32>
    tpu.vector_store %arg7[%c0_11, %c0_12], %12 {strides = array<i32>} : memref<14x160xf32, #tpu.memory_space<vmem>>, vector<14x160xf32>,
    %14 = tpu.iota {dimensions = array<i32: 0>} : vector<8x384xi32>
    %c0_i32 = arith.constant 0 : i32
    %15 = vector.broadcast %c0_i32 : i32 to vector<8x384xi32>
    %16 = arith.cmpi eq, %14, %15 : vector<8x384xi32>
    %cst_13 = arith.constant 0xFF800000 : f32
    %cst_14 = arith.constant 0.000000e+00 : f32
    %17 = vector.broadcast %cst_13 : f32 to vector<8x384xf32>
    %18 = vector.broadcast %cst_14 : f32 to vector<8x384xf32>
    %19 = arith.select %16, %17, %18 : vector<8x384xi1>, vector<8x384xf32>
    %c0_15 = arith.constant 0 : index
    %c0_16 = arith.constant 0 : index
    %20 = vector.load %arg9[%c0_15, %c0_16] : memref<8x384xf32, #tpu.memory_space<vmem>>, vector<8x384xf32>
    tpu.vector_store %arg9[%c0_15, %c0_16], %19 {strides = array<i32>} : memref<8x384xf32, #tpu.memory_space<vmem>>, vector<8x384xf32>,
    %21 = tpu.iota {dimensions = array<i32: 1>} : vector<1x128xi32>
    %22 = arith.sitofp %21 : vector<1x128xi32> to vector<1x128xf32>
    %cst_17 = arith.constant 1.562500e-02 : f32
    %23 = vector.broadcast %cst_17 : f32 to vector<1x128xf32>
    %24 = arith.mulf %22, %23 : vector<1x128xf32>
    %25 = math.floor %24 : vector<1x128xf32>
    %c0_18 = arith.constant 0 : index
    %c0_19 = arith.constant 0 : index
    %26 = vector.load %arg6[%c0_18, %c0_19] : memref<2x160xf32, #tpu.memory_space<vmem>>, vector<1x128xf32>
    %c1 = arith.constant 1 : index
    %c0_20 = arith.constant 0 : index
    %27 = vector.load %arg6[%c1, %c0_20] : memref<2x160xf32, #tpu.memory_space<vmem>>, vector<1x128xf32>
    %c0_21 = arith.constant 0 : index
    %c0_22 = arith.constant 0 : index
    %28 = vector.load %arg7[%c0_21, %c0_22] : memref<14x160xf32, #tpu.memory_space<vmem>>, vector<3x128xf32>
    %cst_23 = arith.constant 0.000000e+00 : f32
    %29 = vector.broadcast %cst_23 : f32 to vector<3x128xf32>
    %30 = arith.subf %29, %28 : vector<3x128xf32>
    %31 = math.exp %30 : vector<3x128xf32>
    %cst_24 = arith.constant 1.000000e+00 : f32
    %32 = vector.broadcast %cst_24 : f32 to vector<3x128xf32>
    %33 = arith.addf %32, %31 : vector<3x128xf32>
    %cst_25 = arith.constant 1.000000e+00 : f32
    %34 = vector.broadcast %cst_25 : f32 to vector<3x128xf32>
    %35 = arith.divf %34, %33 : vector<3x128xf32>
    %cst_26 = arith.constant dense<0xFF800000> : vector<128xf32>
    %36 = vector.multi_reduction <maximumf>, %35, %cst_26 [0] : vector<3x128xf32> to vector<128xf32>
    %37 = vector.shape_cast %36 : vector<128xf32> to vector<1x128xf32>
    %cst_27 = arith.constant 3.000000e-01 : f32
    %38 = vector.broadcast %cst_27 : f32 to vector<1x128xf32>
    %39 = arith.cmpf oge, %37, %38 : vector<1x128xf32>
    %40 = tpu.iota {dimensions = array<i32: 0>} : vector<3x128xi32>
    %41 = arith.sitofp %40 : vector<3x128xi32> to vector<3x128xf32>
    %42 = vector.broadcast %37 : vector<1x128xf32> to vector<3x128xf32>
    %43 = arith.cmpf oeq, %35, %42 : vector<3x128xf32>
    %cst_28 = arith.constant 3.000000e+00 : f32
    %44 = vector.broadcast %cst_28 : f32 to vector<3x128xf32>
    %45 = arith.select %43, %41, %44 : vector<3x128xi1>, vector<3x128xf32>
    %cst_29 = arith.constant dense<0x7F800000> : vector<128xf32>
    %46 = vector.multi_reduction <minimumf>, %45, %cst_29 [0] : vector<3x128xf32> to vector<128xf32>
    %47 = vector.shape_cast %46 : vector<128xf32> to vector<1x128xf32>
    %c6 = arith.constant 6 : index
    %c0_30 = arith.constant 0 : index
    %48 = vector.load %arg7[%c6, %c0_30] : memref<14x160xf32, #tpu.memory_space<vmem>>, vector<1x128xf32>
    %c7 = arith.constant 7 : index
    %c0_31 = arith.constant 0 : index
    %49 = vector.load %arg7[%c7, %c0_31] : memref<14x160xf32, #tpu.memory_space<vmem>>, vector<1x128xf32>
    %c8 = arith.constant 8 : index
    %c0_32 = arith.constant 0 : index
    %50 = vector.load %arg7[%c8, %c0_32] : memref<14x160xf32, #tpu.memory_space<vmem>>, vector<1x128xf32>
    %c9 = arith.constant 9 : index
    %c0_33 = arith.constant 0 : index
    %51 = vector.load %arg7[%c9, %c0_33] : memref<14x160xf32, #tpu.memory_space<vmem>>, vector<1x128xf32>
    %cst_34 = arith.constant 2.000000e+00 : f32
    %52 = vector.broadcast %cst_34 : f32 to vector<1x128xf32>
    %53 = arith.mulf %48, %52 : vector<1x128xf32>
    %54 = arith.addf %26, %53 : vector<1x128xf32>
    %cst_35 = arith.constant 2.000000e+00 : f32
    %55 = vector.broadcast %cst_35 : f32 to vector<1x128xf32>
    %56 = arith.mulf %49, %55 : vector<1x128xf32>
    %57 = arith.addf %27, %56 : vector<1x128xf32>
    %cst_36 = arith.constant 4.13516665 : f32
    %58 = vector.broadcast %cst_36 : f32 to vector<1x128xf32>
    %59 = arith.minimumf %50, %58 : vector<1x128xf32>
    %60 = math.exp %59 : vector<1x128xf32>
    %cst_37 = arith.constant 2.000000e+00 : f32
    %61 = vector.broadcast %cst_37 : f32 to vector<1x128xf32>
    %62 = arith.mulf %61, %60 : vector<1x128xf32>
    %cst_38 = arith.constant 4.13516665 : f32
    %63 = vector.broadcast %cst_38 : f32 to vector<1x128xf32>
    %64 = arith.minimumf %51, %63 : vector<1x128xf32>
    %65 = math.exp %64 : vector<1x128xf32>
    %cst_39 = arith.constant 2.000000e+00 : f32
    %66 = vector.broadcast %cst_39 : f32 to vector<1x128xf32>
    %67 = arith.mulf %66, %65 : vector<1x128xf32>
    %cst_40 = arith.constant 0xFF800000 : f32
    %68 = vector.broadcast %cst_40 : f32 to vector<1x128xf32>
    %69 = arith.select %39, %37, %68 : vector<1x128xi1>, vector<1x128xf32>
    %c0_41 = arith.constant 0 : index
    %c0_42 = arith.constant 0 : index
    %70 = vector.load %arg9[%c0_41, %c0_42] : memref<8x384xf32, #tpu.memory_space<vmem>>, vector<1x128xf32>
    tpu.vector_store %arg9[%c0_41, %c0_42], %69 {strides = array<i32>} : memref<8x384xf32, #tpu.memory_space<vmem>>, vector<1x128xf32>,
    %c1_43 = arith.constant 1 : index
    %c0_44 = arith.constant 0 : index
    %71 = vector.load %arg9[%c1_43, %c0_44] : memref<8x384xf32, #tpu.memory_space<vmem>>, vector<1x128xf32>
    tpu.vector_store %arg9[%c1_43, %c0_44], %47 {strides = array<i32>} : memref<8x384xf32, #tpu.memory_space<vmem>>, vector<1x128xf32>,
    %c2 = arith.constant 2 : index
    %c0_45 = arith.constant 0 : index
    %72 = vector.load %arg9[%c2, %c0_45] : memref<8x384xf32, #tpu.memory_space<vmem>>, vector<1x128xf32>
    tpu.vector_store %arg9[%c2, %c0_45], %25 {strides = array<i32>} : memref<8x384xf32, #tpu.memory_space<vmem>>, vector<1x128xf32>,
    %cst_46 = arith.constant 5.000000e-01 : f32
    %73 = vector.broadcast %cst_46 : f32 to vector<1x128xf32>
    %74 = arith.mulf %73, %62 : vector<1x128xf32>
    %75 = arith.subf %54, %74 : vector<1x128xf32>
    %c3 = arith.constant 3 : index
    %c0_47 = arith.constant 0 : index
    %76 = vector.load %arg9[%c3, %c0_47] : memref<8x384xf32, #tpu.memory_space<vmem>>, vector<1x128xf32>
    tpu.vector_store %arg9[%c3, %c0_47], %75 {strides = array<i32>} : memref<8x384xf32, #tpu.memory_space<vmem>>, vector<1x128xf32>,
    %cst_48 = arith.constant 5.000000e-01 : f32
    %77 = vector.broadcast %cst_48 : f32 to vector<1x128xf32>
    %78 = arith.mulf %77, %67 : vector<1x128xf32>
    %79 = arith.subf %57, %78 : vector<1x128xf32>
    %c4 = arith.constant 4 : index
    %c0_49 = arith.constant 0 : index
    %80 = vector.load %arg9[%c4, %c0_49] : memref<8x384xf32, #tpu.memory_space<vmem>>, vector<1x128xf32>
    tpu.vector_store %arg9[%c4, %c0_49], %79 {strides = array<i32>} : memref<8x384xf32, #tpu.memory_space<vmem>>, vector<1x128xf32>,
    %cst_50 = arith.constant 5.000000e-01 : f32
    %81 = vector.broadcast %cst_50 : f32 to vector<1x128xf32>
    %82 = arith.mulf %81, %62 : vector<1x128xf32>
    %83 = arith.addf %54, %82 : vector<1x128xf32>
    %c5 = arith.constant 5 : index
    %c0_51 = arith.constant 0 : index
    %84 = vector.load %arg9[%c5, %c0_51] : memref<8x384xf32, #tpu.memory_space<vmem>>, vector<1x128xf32>
    tpu.vector_store %arg9[%c5, %c0_51], %83 {strides = array<i32>} : memref<8x384xf32, #tpu.memory_space<vmem>>, vector<1x128xf32>,
    %cst_52 = arith.constant 5.000000e-01 : f32
    %85 = vector.broadcast %cst_52 : f32 to vector<1x128xf32>
    %86 = arith.mulf %85, %67 : vector<1x128xf32>
    %87 = arith.addf %57, %86 : vector<1x128xf32>
    %c6_53 = arith.constant 6 : index
    %c0_54 = arith.constant 0 : index
    %88 = vector.load %arg9[%c6_53, %c0_54] : memref<8x384xf32, #tpu.memory_space<vmem>>, vector<1x128xf32>
    tpu.vector_store %arg9[%c6_53, %c0_54], %87 {strides = array<i32>} : memref<8x384xf32, #tpu.memory_space<vmem>>, vector<1x128xf32>,
    %c3_55 = arith.constant 3 : index
    %c0_56 = arith.constant 0 : index
    %89 = vector.load %arg7[%c3_55, %c0_56] : memref<14x160xf32, #tpu.memory_space<vmem>>, vector<3x128xf32>
    %cst_57 = arith.constant 0.000000e+00 : f32
    %90 = vector.broadcast %cst_57 : f32 to vector<3x128xf32>
    %91 = arith.subf %90, %89 : vector<3x128xf32>
    %92 = math.exp %91 : vector<3x128xf32>
    %cst_58 = arith.constant 1.000000e+00 : f32
    %93 = vector.broadcast %cst_58 : f32 to vector<3x128xf32>
    %94 = arith.addf %93, %92 : vector<3x128xf32>
    %cst_59 = arith.constant 1.000000e+00 : f32
    %95 = vector.broadcast %cst_59 : f32 to vector<3x128xf32>
    %96 = arith.divf %95, %94 : vector<3x128xf32>
    %cst_60 = arith.constant dense<0xFF800000> : vector<128xf32>
    %97 = vector.multi_reduction <maximumf>, %96, %cst_60 [0] : vector<3x128xf32> to vector<128xf32>
    %98 = vector.shape_cast %97 : vector<128xf32> to vector<1x128xf32>
    %cst_61 = arith.constant 3.000000e-01 : f32
    %99 = vector.broadcast %cst_61 : f32 to vector<1x128xf32>
    %100 = arith.cmpf oge, %98, %99 : vector<1x128xf32>
    %101 = tpu.iota {dimensions = array<i32: 0>} : vector<3x128xi32>
    %102 = arith.sitofp %101 : vector<3x128xi32> to vector<3x128xf32>
    %103 = vector.broadcast %98 : vector<1x128xf32> to vector<3x128xf32>
    %104 = arith.cmpf oeq, %96, %103 : vector<3x128xf32>
    %cst_62 = arith.constant 3.000000e+00 : f32
    %105 = vector.broadcast %cst_62 : f32 to vector<3x128xf32>
    %106 = arith.select %104, %102, %105 : vector<3x128xi1>, vector<3x128xf32>
    %cst_63 = arith.constant dense<0x7F800000> : vector<128xf32>
    %107 = vector.multi_reduction <minimumf>, %106, %cst_63 [0] : vector<3x128xf32> to vector<128xf32>
    %108 = vector.shape_cast %107 : vector<128xf32> to vector<1x128xf32>
    %c10 = arith.constant 10 : index
    %c0_64 = arith.constant 0 : index
    %109 = vector.load %arg7[%c10, %c0_64] : memref<14x160xf32, #tpu.memory_space<vmem>>, vector<1x128xf32>
    %c11 = arith.constant 11 : index
    %c0_65 = arith.constant 0 : index
    %110 = vector.load %arg7[%c11, %c0_65] : memref<14x160xf32, #tpu.memory_space<vmem>>, vector<1x128xf32>
    %c12 = arith.constant 12 : index
    %c0_66 = arith.constant 0 : index
    %111 = vector.load %arg7[%c12, %c0_66] : memref<14x160xf32, #tpu.memory_space<vmem>>, vector<1x128xf32>
    %c13 = arith.constant 13 : index
    %c0_67 = arith.constant 0 : index
    %112 = vector.load %arg7[%c13, %c0_67] : memref<14x160xf32, #tpu.memory_space<vmem>>, vector<1x128xf32>
    %cst_68 = arith.constant 3.000000e+00 : f32
    %113 = vector.broadcast %cst_68 : f32 to vector<1x128xf32>
    %114 = arith.mulf %109, %113 : vector<1x128xf32>
    %115 = arith.addf %26, %114 : vector<1x128xf32>
    %cst_69 = arith.constant 3.000000e+00 : f32
    %116 = vector.broadcast %cst_69 : f32 to vector<1x128xf32>
    %117 = arith.mulf %110, %116 : vector<1x128xf32>
    %118 = arith.addf %27, %117 : vector<1x128xf32>
    %cst_70 = arith.constant 4.13516665 : f32
    %119 = vector.broadcast %cst_70 : f32 to vector<1x128xf32>
    %120 = arith.minimumf %111, %119 : vector<1x128xf32>
    %121 = math.exp %120 : vector<1x128xf32>
    %cst_71 = arith.constant 3.000000e+00 : f32
    %122 = vector.broadcast %cst_71 : f32 to vector<1x128xf32>
    %123 = arith.mulf %122, %121 : vector<1x128xf32>
    %cst_72 = arith.constant 4.13516665 : f32
    %124 = vector.broadcast %cst_72 : f32 to vector<1x128xf32>
    %125 = arith.minimumf %112, %124 : vector<1x128xf32>
    %126 = math.exp %125 : vector<1x128xf32>
    %cst_73 = arith.constant 3.000000e+00 : f32
    %127 = vector.broadcast %cst_73 : f32 to vector<1x128xf32>
    %128 = arith.mulf %127, %126 : vector<1x128xf32>
    %cst_74 = arith.constant 0xFF800000 : f32
    %129 = vector.broadcast %cst_74 : f32 to vector<1x128xf32>
    %130 = arith.select %100, %98, %129 : vector<1x128xi1>, vector<1x128xf32>
    %c0_75 = arith.constant 0 : index
    %c128 = arith.constant 128 : index
    %131 = vector.load %arg9[%c0_75, %c128] : memref<8x384xf32, #tpu.memory_space<vmem>>, vector<1x128xf32>
    tpu.vector_store %arg9[%c0_75, %c128], %130 {strides = array<i32>} : memref<8x384xf32, #tpu.memory_space<vmem>>, vector<1x128xf32>,
    %c1_76 = arith.constant 1 : index
    %c128_77 = arith.constant 128 : index
    %132 = vector.load %arg9[%c1_76, %c128_77] : memref<8x384xf32, #tpu.memory_space<vmem>>, vector<1x128xf32>
    tpu.vector_store %arg9[%c1_76, %c128_77], %108 {strides = array<i32>} : memref<8x384xf32, #tpu.memory_space<vmem>>, vector<1x128xf32>,
    %c2_78 = arith.constant 2 : index
    %c128_79 = arith.constant 128 : index
    %133 = vector.load %arg9[%c2_78, %c128_79] : memref<8x384xf32, #tpu.memory_space<vmem>>, vector<1x128xf32>
    tpu.vector_store %arg9[%c2_78, %c128_79], %25 {strides = array<i32>} : memref<8x384xf32, #tpu.memory_space<vmem>>, vector<1x128xf32>,
    %cst_80 = arith.constant 5.000000e-01 : f32
    %134 = vector.broadcast %cst_80 : f32 to vector<1x128xf32>
    %135 = arith.mulf %134, %123 : vector<1x128xf32>
    %136 = arith.subf %115, %135 : vector<1x128xf32>
    %c3_81 = arith.constant 3 : index
    %c128_82 = arith.constant 128 : index
    %137 = vector.load %arg9[%c3_81, %c128_82] : memref<8x384xf32, #tpu.memory_space<vmem>>, vector<1x128xf32>
    tpu.vector_store %arg9[%c3_81, %c128_82], %136 {strides = array<i32>} : memref<8x384xf32, #tpu.memory_space<vmem>>, vector<1x128xf32>,
    %cst_83 = arith.constant 5.000000e-01 : f32
    %138 = vector.broadcast %cst_83 : f32 to vector<1x128xf32>
    %139 = arith.mulf %138, %128 : vector<1x128xf32>
    %140 = arith.subf %118, %139 : vector<1x128xf32>
    %c4_84 = arith.constant 4 : index
    %c128_85 = arith.constant 128 : index
    %141 = vector.load %arg9[%c4_84, %c128_85] : memref<8x384xf32, #tpu.memory_space<vmem>>, vector<1x128xf32>
    tpu.vector_store %arg9[%c4_84, %c128_85], %140 {strides = array<i32>} : memref<8x384xf32, #tpu.memory_space<vmem>>, vector<1x128xf32>,
    %cst_86 = arith.constant 5.000000e-01 : f32
    %142 = vector.broadcast %cst_86 : f32 to vector<1x128xf32>
    %143 = arith.mulf %142, %123 : vector<1x128xf32>
    %144 = arith.addf %115, %143 : vector<1x128xf32>
    %c5_87 = arith.constant 5 : index
    %c128_88 = arith.constant 128 : index
    %145 = vector.load %arg9[%c5_87, %c128_88] : memref<8x384xf32, #tpu.memory_space<vmem>>, vector<1x128xf32>
    tpu.vector_store %arg9[%c5_87, %c128_88], %144 {strides = array<i32>} : memref<8x384xf32, #tpu.memory_space<vmem>>, vector<1x128xf32>,
    %cst_89 = arith.constant 5.000000e-01 : f32
    %146 = vector.broadcast %cst_89 : f32 to vector<1x128xf32>
    %147 = arith.mulf %146, %128 : vector<1x128xf32>
    %148 = arith.addf %118, %147 : vector<1x128xf32>
    %c6_90 = arith.constant 6 : index
    %c128_91 = arith.constant 128 : index
    %149 = vector.load %arg9[%c6_90, %c128_91] : memref<8x384xf32, #tpu.memory_space<vmem>>, vector<1x128xf32>
    tpu.vector_store %arg9[%c6_90, %c128_91], %148 {strides = array<i32>} : memref<8x384xf32, #tpu.memory_space<vmem>>, vector<1x128xf32>,
    %150 = tpu.iota {dimensions = array<i32: 1>} : vector<1x32xi32>
    %151 = arith.sitofp %150 : vector<1x32xi32> to vector<1x32xf32>
    %cst_92 = arith.constant 6.250000e-02 : f32
    %152 = vector.broadcast %cst_92 : f32 to vector<1x32xf32>
    %153 = arith.mulf %151, %152 : vector<1x32xf32>
    %154 = math.floor %153 : vector<1x32xf32>
    %c0_93 = arith.constant 0 : index
    %c128_94 = arith.constant 128 : index
    %155 = vector.load %arg6[%c0_93, %c128_94] : memref<2x160xf32, #tpu.memory_space<vmem>>, vector<1x32xf32>
    %c1_95 = arith.constant 1 : index
    %c128_96 = arith.constant 128 : index
    %156 = vector.load %arg6[%c1_95, %c128_96] : memref<2x160xf32, #tpu.memory_space<vmem>>, vector<1x32xf32>
    %c0_97 = arith.constant 0 : index
    %c128_98 = arith.constant 128 : index
    %157 = vector.load %arg7[%c0_97, %c128_98] : memref<14x160xf32, #tpu.memory_space<vmem>>, vector<3x32xf32>
    %cst_99 = arith.constant 0.000000e+00 : f32
    %158 = vector.broadcast %cst_99 : f32 to vector<3x32xf32>
    %159 = arith.subf %158, %157 : vector<3x32xf32>
    %160 = math.exp %159 : vector<3x32xf32>
    %cst_100 = arith.constant 1.000000e+00 : f32
    %161 = vector.broadcast %cst_100 : f32 to vector<3x32xf32>
    %162 = arith.addf %161, %160 : vector<3x32xf32>
    %cst_101 = arith.constant 1.000000e+00 : f32
    %163 = vector.broadcast %cst_101 : f32 to vector<3x32xf32>
    %164 = arith.divf %163, %162 : vector<3x32xf32>
    %cst_102 = arith.constant dense<0xFF800000> : vector<32xf32>
    %165 = vector.multi_reduction <maximumf>, %164, %cst_102 [0] : vector<3x32xf32> to vector<32xf32>
    %166 = vector.shape_cast %165 : vector<32xf32> to vector<1x32xf32>
    %cst_103 = arith.constant 3.000000e-01 : f32
    %167 = vector.broadcast %cst_103 : f32 to vector<1x32xf32>
    %168 = arith.cmpf oge, %166, %167 : vector<1x32xf32>
    %169 = tpu.iota {dimensions = array<i32: 0>} : vector<3x32xi32>
    %170 = arith.sitofp %169 : vector<3x32xi32> to vector<3x32xf32>
    %171 = vector.broadcast %166 : vector<1x32xf32> to vector<3x32xf32>
    %172 = arith.cmpf oeq, %164, %171 : vector<3x32xf32>
    %cst_104 = arith.constant 3.000000e+00 : f32
    %173 = vector.broadcast %cst_104 : f32 to vector<3x32xf32>
    %174 = arith.select %172, %170, %173 : vector<3x32xi1>, vector<3x32xf32>
    %cst_105 = arith.constant dense<0x7F800000> : vector<32xf32>
    %175 = vector.multi_reduction <minimumf>, %174, %cst_105 [0] : vector<3x32xf32> to vector<32xf32>
    %176 = vector.shape_cast %175 : vector<32xf32> to vector<1x32xf32>
    %c6_106 = arith.constant 6 : index
    %c128_107 = arith.constant 128 : index
    %177 = vector.load %arg7[%c6_106, %c128_107] : memref<14x160xf32, #tpu.memory_space<vmem>>, vector<1x32xf32>
    %c7_108 = arith.constant 7 : index
    %c128_109 = arith.constant 128 : index
    %178 = vector.load %arg7[%c7_108, %c128_109] : memref<14x160xf32, #tpu.memory_space<vmem>>, vector<1x32xf32>
    %c8_110 = arith.constant 8 : index
    %c128_111 = arith.constant 128 : index
    %179 = vector.load %arg7[%c8_110, %c128_111] : memref<14x160xf32, #tpu.memory_space<vmem>>, vector<1x32xf32>
    %c9_112 = arith.constant 9 : index
    %c128_113 = arith.constant 128 : index
    %180 = vector.load %arg7[%c9_112, %c128_113] : memref<14x160xf32, #tpu.memory_space<vmem>>, vector<1x32xf32>
    %cst_114 = arith.constant 4.000000e+00 : f32
    %181 = vector.broadcast %cst_114 : f32 to vector<1x32xf32>
    %182 = arith.mulf %177, %181 : vector<1x32xf32>
    %183 = arith.addf %155, %182 : vector<1x32xf32>
    %cst_115 = arith.constant 4.000000e+00 : f32
    %184 = vector.broadcast %cst_115 : f32 to vector<1x32xf32>
    %185 = arith.mulf %178, %184 : vector<1x32xf32>
    %186 = arith.addf %156, %185 : vector<1x32xf32>
    %cst_116 = arith.constant 4.13516665 : f32
    %187 = vector.broadcast %cst_116 : f32 to vector<1x32xf32>
    %188 = arith.minimumf %179, %187 : vector<1x32xf32>
    %189 = math.exp %188 : vector<1x32xf32>
    %cst_117 = arith.constant 4.000000e+00 : f32
    %190 = vector.broadcast %cst_117 : f32 to vector<1x32xf32>
    %191 = arith.mulf %190, %189 : vector<1x32xf32>
    %cst_118 = arith.constant 4.13516665 : f32
    %192 = vector.broadcast %cst_118 : f32 to vector<1x32xf32>
    %193 = arith.minimumf %180, %192 : vector<1x32xf32>
    %194 = math.exp %193 : vector<1x32xf32>
    %cst_119 = arith.constant 4.000000e+00 : f32
    %195 = vector.broadcast %cst_119 : f32 to vector<1x32xf32>
    %196 = arith.mulf %195, %194 : vector<1x32xf32>
    %cst_120 = arith.constant 0xFF800000 : f32
    %197 = vector.broadcast %cst_120 : f32 to vector<1x32xf32>
    %198 = arith.select %168, %166, %197 : vector<1x32xi1>, vector<1x32xf32>
    %c0_121 = arith.constant 0 : index
    %c256 = arith.constant 256 : index
    %199 = vector.load %arg9[%c0_121, %c256] : memref<8x384xf32, #tpu.memory_space<vmem>>, vector<1x32xf32>
    tpu.vector_store %arg9[%c0_121, %c256], %198 {strides = array<i32>} : memref<8x384xf32, #tpu.memory_space<vmem>>, vector<1x32xf32>,
    %c1_122 = arith.constant 1 : index
    %c256_123 = arith.constant 256 : index
    %200 = vector.load %arg9[%c1_122, %c256_123] : memref<8x384xf32, #tpu.memory_space<vmem>>, vector<1x32xf32>
    tpu.vector_store %arg9[%c1_122, %c256_123], %176 {strides = array<i32>} : memref<8x384xf32, #tpu.memory_space<vmem>>, vector<1x32xf32>,
    %c2_124 = arith.constant 2 : index
    %c256_125 = arith.constant 256 : index
    %201 = vector.load %arg9[%c2_124, %c256_125] : memref<8x384xf32, #tpu.memory_space<vmem>>, vector<1x32xf32>
    tpu.vector_store %arg9[%c2_124, %c256_125], %154 {strides = array<i32>} : memref<8x384xf32, #tpu.memory_space<vmem>>, vector<1x32xf32>,
    %cst_126 = arith.constant 5.000000e-01 : f32
    %202 = vector.broadcast %cst_126 : f32 to vector<1x32xf32>
    %203 = arith.mulf %202, %191 : vector<1x32xf32>
    %204 = arith.subf %183, %203 : vector<1x32xf32>
    %c3_127 = arith.constant 3 : index
    %c256_128 = arith.constant 256 : index
    %205 = vector.load %arg9[%c3_127, %c256_128] : memref<8x384xf32, #tpu.memory_space<vmem>>, vector<1x32xf32>
    tpu.vector_store %arg9[%c3_127, %c256_128], %204 {strides = array<i32>} : memref<8x384xf32, #tpu.memory_space<vmem>>, vector<1x32xf32>,
    %cst_129 = arith.constant 5.000000e-01 : f32
    %206 = vector.broadcast %cst_129 : f32 to vector<1x32xf32>
    %207 = arith.mulf %206, %196 : vector<1x32xf32>
    %208 = arith.subf %186, %207 : vector<1x32xf32>
    %c4_130 = arith.constant 4 : index
    %c256_131 = arith.constant 256 : index
    %209 = vector.load %arg9[%c4_130, %c256_131] : memref<8x384xf32, #tpu.memory_space<vmem>>, vector<1x32xf32>
    tpu.vector_store %arg9[%c4_130, %c256_131], %208 {strides = array<i32>} : memref<8x384xf32, #tpu.memory_space<vmem>>, vector<1x32xf32>,
    %cst_132 = arith.constant 5.000000e-01 : f32
    %210 = vector.broadcast %cst_132 : f32 to vector<1x32xf32>
    %211 = arith.mulf %210, %191 : vector<1x32xf32>
    %212 = arith.addf %183, %211 : vector<1x32xf32>
    %c5_133 = arith.constant 5 : index
    %c256_134 = arith.constant 256 : index
    %213 = vector.load %arg9[%c5_133, %c256_134] : memref<8x384xf32, #tpu.memory_space<vmem>>, vector<1x32xf32>
    tpu.vector_store %arg9[%c5_133, %c256_134], %212 {strides = array<i32>} : memref<8x384xf32, #tpu.memory_space<vmem>>, vector<1x32xf32>,
    %cst_135 = arith.constant 5.000000e-01 : f32
    %214 = vector.broadcast %cst_135 : f32 to vector<1x32xf32>
    %215 = arith.mulf %214, %196 : vector<1x32xf32>
    %216 = arith.addf %186, %215 : vector<1x32xf32>
    %c6_136 = arith.constant 6 : index
    %c256_137 = arith.constant 256 : index
    %217 = vector.load %arg9[%c6_136, %c256_137] : memref<8x384xf32, #tpu.memory_space<vmem>>, vector<1x32xf32>
    tpu.vector_store %arg9[%c6_136, %c256_137], %216 {strides = array<i32>} : memref<8x384xf32, #tpu.memory_space<vmem>>, vector<1x32xf32>,
    %c3_138 = arith.constant 3 : index
    %c128_139 = arith.constant 128 : index
    %218 = vector.load %arg7[%c3_138, %c128_139] : memref<14x160xf32, #tpu.memory_space<vmem>>, vector<3x32xf32>
    %cst_140 = arith.constant 0.000000e+00 : f32
    %219 = vector.broadcast %cst_140 : f32 to vector<3x32xf32>
    %220 = arith.subf %219, %218 : vector<3x32xf32>
    %221 = math.exp %220 : vector<3x32xf32>
    %cst_141 = arith.constant 1.000000e+00 : f32
    %222 = vector.broadcast %cst_141 : f32 to vector<3x32xf32>
    %223 = arith.addf %222, %221 : vector<3x32xf32>
    %cst_142 = arith.constant 1.000000e+00 : f32
    %224 = vector.broadcast %cst_142 : f32 to vector<3x32xf32>
    %225 = arith.divf %224, %223 : vector<3x32xf32>
    %cst_143 = arith.constant dense<0xFF800000> : vector<32xf32>
    %226 = vector.multi_reduction <maximumf>, %225, %cst_143 [0] : vector<3x32xf32> to vector<32xf32>
    %227 = vector.shape_cast %226 : vector<32xf32> to vector<1x32xf32>
    %cst_144 = arith.constant 3.000000e-01 : f32
    %228 = vector.broadcast %cst_144 : f32 to vector<1x32xf32>
    %229 = arith.cmpf oge, %227, %228 : vector<1x32xf32>
    %230 = tpu.iota {dimensions = array<i32: 0>} : vector<3x32xi32>
    %231 = arith.sitofp %230 : vector<3x32xi32> to vector<3x32xf32>
    %232 = vector.broadcast %227 : vector<1x32xf32> to vector<3x32xf32>
    %233 = arith.cmpf oeq, %225, %232 : vector<3x32xf32>
    %cst_145 = arith.constant 3.000000e+00 : f32
    %234 = vector.broadcast %cst_145 : f32 to vector<3x32xf32>
    %235 = arith.select %233, %231, %234 : vector<3x32xi1>, vector<3x32xf32>
    %cst_146 = arith.constant dense<0x7F800000> : vector<32xf32>
    %236 = vector.multi_reduction <minimumf>, %235, %cst_146 [0] : vector<3x32xf32> to vector<32xf32>
    %237 = vector.shape_cast %236 : vector<32xf32> to vector<1x32xf32>
    %c10_147 = arith.constant 10 : index
    %c128_148 = arith.constant 128 : index
    %238 = vector.load %arg7[%c10_147, %c128_148] : memref<14x160xf32, #tpu.memory_space<vmem>>, vector<1x32xf32>
    %c11_149 = arith.constant 11 : index
    %c128_150 = arith.constant 128 : index
    %239 = vector.load %arg7[%c11_149, %c128_150] : memref<14x160xf32, #tpu.memory_space<vmem>>, vector<1x32xf32>
    %c12_151 = arith.constant 12 : index
    %c128_152 = arith.constant 128 : index
    %240 = vector.load %arg7[%c12_151, %c128_152] : memref<14x160xf32, #tpu.memory_space<vmem>>, vector<1x32xf32>
    %c13_153 = arith.constant 13 : index
    %c128_154 = arith.constant 128 : index
    %241 = vector.load %arg7[%c13_153, %c128_154] : memref<14x160xf32, #tpu.memory_space<vmem>>, vector<1x32xf32>
    %cst_155 = arith.constant 6.000000e+00 : f32
    %242 = vector.broadcast %cst_155 : f32 to vector<1x32xf32>
    %243 = arith.mulf %238, %242 : vector<1x32xf32>
    %244 = arith.addf %155, %243 : vector<1x32xf32>
    %cst_156 = arith.constant 6.000000e+00 : f32
    %245 = vector.broadcast %cst_156 : f32 to vector<1x32xf32>
    %246 = arith.mulf %239, %245 : vector<1x32xf32>
    %247 = arith.addf %156, %246 : vector<1x32xf32>
    %cst_157 = arith.constant 4.13516665 : f32
    %248 = vector.broadcast %cst_157 : f32 to vector<1x32xf32>
    %249 = arith.minimumf %240, %248 : vector<1x32xf32>
    %250 = math.exp %249 : vector<1x32xf32>
    %cst_158 = arith.constant 6.000000e+00 : f32
    %251 = vector.broadcast %cst_158 : f32 to vector<1x32xf32>
    %252 = arith.mulf %251, %250 : vector<1x32xf32>
    %cst_159 = arith.constant 4.13516665 : f32
    %253 = vector.broadcast %cst_159 : f32 to vector<1x32xf32>
    %254 = arith.minimumf %241, %253 : vector<1x32xf32>
    %255 = math.exp %254 : vector<1x32xf32>
    %cst_160 = arith.constant 6.000000e+00 : f32
    %256 = vector.broadcast %cst_160 : f32 to vector<1x32xf32>
    %257 = arith.mulf %256, %255 : vector<1x32xf32>
    %cst_161 = arith.constant 0xFF800000 : f32
    %258 = vector.broadcast %cst_161 : f32 to vector<1x32xf32>
    %259 = arith.select %229, %227, %258 : vector<1x32xi1>, vector<1x32xf32>
    %c0_162 = arith.constant 0 : index
    %c288 = arith.constant 288 : index
    %260 = vector.load %arg9[%c0_162, %c288] : memref<8x384xf32, #tpu.memory_space<vmem>>, vector<1x32xf32>
    tpu.vector_store %arg9[%c0_162, %c288], %259 {strides = array<i32>} : memref<8x384xf32, #tpu.memory_space<vmem>>, vector<1x32xf32>,
    %c1_163 = arith.constant 1 : index
    %c288_164 = arith.constant 288 : index
    %261 = vector.load %arg9[%c1_163, %c288_164] : memref<8x384xf32, #tpu.memory_space<vmem>>, vector<1x32xf32>
    tpu.vector_store %arg9[%c1_163, %c288_164], %237 {strides = array<i32>} : memref<8x384xf32, #tpu.memory_space<vmem>>, vector<1x32xf32>,
    %c2_165 = arith.constant 2 : index
    %c288_166 = arith.constant 288 : index
    %262 = vector.load %arg9[%c2_165, %c288_166] : memref<8x384xf32, #tpu.memory_space<vmem>>, vector<1x32xf32>
    tpu.vector_store %arg9[%c2_165, %c288_166], %154 {strides = array<i32>} : memref<8x384xf32, #tpu.memory_space<vmem>>, vector<1x32xf32>,
    %cst_167 = arith.constant 5.000000e-01 : f32
    %263 = vector.broadcast %cst_167 : f32 to vector<1x32xf32>
    %264 = arith.mulf %263, %252 : vector<1x32xf32>
    %265 = arith.subf %244, %264 : vector<1x32xf32>
    %c3_168 = arith.constant 3 : index
    %c288_169 = arith.constant 288 : index
    %266 = vector.load %arg9[%c3_168, %c288_169] : memref<8x384xf32, #tpu.memory_space<vmem>>, vector<1x32xf32>
    tpu.vector_store %arg9[%c3_168, %c288_169], %265 {strides = array<i32>} : memref<8x384xf32, #tpu.memory_space<vmem>>, vector<1x32xf32>,
    %cst_170 = arith.constant 5.000000e-01 : f32
    %267 = vector.broadcast %cst_170 : f32 to vector<1x32xf32>
    %268 = arith.mulf %267, %257 : vector<1x32xf32>
    %269 = arith.subf %247, %268 : vector<1x32xf32>
    %c4_171 = arith.constant 4 : index
    %c288_172 = arith.constant 288 : index
    %270 = vector.load %arg9[%c4_171, %c288_172] : memref<8x384xf32, #tpu.memory_space<vmem>>, vector<1x32xf32>
    tpu.vector_store %arg9[%c4_171, %c288_172], %269 {strides = array<i32>} : memref<8x384xf32, #tpu.memory_space<vmem>>, vector<1x32xf32>,
    %cst_173 = arith.constant 5.000000e-01 : f32
    %271 = vector.broadcast %cst_173 : f32 to vector<1x32xf32>
    %272 = arith.mulf %271, %252 : vector<1x32xf32>
    %273 = arith.addf %244, %272 : vector<1x32xf32>
    %c5_174 = arith.constant 5 : index
    %c288_175 = arith.constant 288 : index
    %274 = vector.load %arg9[%c5_174, %c288_175] : memref<8x384xf32, #tpu.memory_space<vmem>>, vector<1x32xf32>
    tpu.vector_store %arg9[%c5_174, %c288_175], %273 {strides = array<i32>} : memref<8x384xf32, #tpu.memory_space<vmem>>, vector<1x32xf32>,
    %cst_176 = arith.constant 5.000000e-01 : f32
    %275 = vector.broadcast %cst_176 : f32 to vector<1x32xf32>
    %276 = arith.mulf %275, %257 : vector<1x32xf32>
    %277 = arith.addf %247, %276 : vector<1x32xf32>
    %c6_177 = arith.constant 6 : index
    %c288_178 = arith.constant 288 : index
    %278 = vector.load %arg9[%c6_177, %c288_178] : memref<8x384xf32, #tpu.memory_space<vmem>>, vector<1x32xf32>
    tpu.vector_store %arg9[%c6_177, %c288_178], %277 {strides = array<i32>} : memref<8x384xf32, #tpu.memory_space<vmem>>, vector<1x32xf32>,
    %c0_179 = arith.constant 0 : index
    %c0_180 = arith.constant 0 : index
    %279 = vector.load %arg9[%c0_179, %c0_180] : memref<8x384xf32, #tpu.memory_space<vmem>>, vector<1x384xf32>
    %c1_181 = arith.constant 1 : index
    %c0_182 = arith.constant 0 : index
    %280 = vector.load %arg9[%c1_181, %c0_182] : memref<8x384xf32, #tpu.memory_space<vmem>>, vector<1x384xf32>
    %c2_183 = arith.constant 2 : index
    %c0_184 = arith.constant 0 : index
    %281 = vector.load %arg9[%c2_183, %c0_184] : memref<8x384xf32, #tpu.memory_space<vmem>>, vector<1x384xf32>
    %c3_185 = arith.constant 3 : index
    %c0_186 = arith.constant 0 : index
    %282 = vector.load %arg9[%c3_185, %c0_186] : memref<8x384xf32, #tpu.memory_space<vmem>>, vector<1x384xf32>
    %c4_187 = arith.constant 4 : index
    %c0_188 = arith.constant 0 : index
    %283 = vector.load %arg9[%c4_187, %c0_188] : memref<8x384xf32, #tpu.memory_space<vmem>>, vector<1x384xf32>
    %c5_189 = arith.constant 5 : index
    %c0_190 = arith.constant 0 : index
    %284 = vector.load %arg9[%c5_189, %c0_190] : memref<8x384xf32, #tpu.memory_space<vmem>>, vector<1x384xf32>
    %c6_191 = arith.constant 6 : index
    %c0_192 = arith.constant 0 : index
    %285 = vector.load %arg9[%c6_191, %c0_192] : memref<8x384xf32, #tpu.memory_space<vmem>>, vector<1x384xf32>
    %286 = arith.subf %284, %282 : vector<1x384xf32>
    %287 = arith.subf %285, %283 : vector<1x384xf32>
    %288 = arith.mulf %286, %287 : vector<1x384xf32>
    %289 = tpu.iota {dimensions = array<i32: 1>} : vector<1x384xi32>
    %290 = arith.sitofp %289 : vector<1x384xi32> to vector<1x384xf32>
    %291 = tpu.iota {dimensions = array<i32: 1>} : vector<16x8xi32>
    %292 = tpu.iota {dimensions = array<i32: 0>} : vector<16x8xi32>
    %cst_193 = arith.constant -1.000000e+00 : f32
    %293 = vector.broadcast %cst_193 : f32 to vector<16x8xf32>
    %c0_i32_194 = arith.constant 0 : i32
    %c16_i32 = arith.constant 16 : i32
    %294 = arith.addi %c0_i32_194, %c16_i32 : i32
    %c1_i32 = arith.constant 1 : i32
    %295:2 = scf.for %arg10 = %c0_i32_194 to %294 step %c1_i32 iter_args(%arg11 = %279, %arg12 = %293) -> (vector<1x384xf32>, vector<16x8xf32>)  : i32 {
      %297 = vector.shape_cast %arg11 : vector<1x384xf32> to vector<1x1x384xf32>
      %cst_198 = arith.constant dense<0xFF800000> : vector<1xf32>
      %298 = vector.multi_reduction <maximumf>, %297, %cst_198 [1, 2] : vector<1x1x384xf32> to vector<1xf32>
      %299 = vector.shape_cast %298 : vector<1xf32> to vector<1x1x1xf32>
      %300 = vector.extract %299[0, 0, 0] : f32 from vector<1x1x1xf32>
      %301 = vector.broadcast %300 : f32 to vector<1x1xf32>
      %302 = vector.broadcast %301 : vector<1x1xf32> to vector<1x384xf32>
      %303 = arith.cmpf oeq, %arg11, %302 : vector<1x384xf32>
      %cst_199 = arith.constant 3.840000e+02 : f32
      %304 = vector.broadcast %cst_199 : f32 to vector<1x384xf32>
      %305 = arith.select %303, %290, %304 : vector<1x384xi1>, vector<1x384xf32>
      %306 = vector.shape_cast %305 : vector<1x384xf32> to vector<1x1x384xf32>
      %cst_200 = arith.constant dense<0x7F800000> : vector<1xf32>
      %307 = vector.multi_reduction <minimumf>, %306, %cst_200 [1, 2] : vector<1x1x384xf32> to vector<1xf32>
      %308 = vector.shape_cast %307 : vector<1xf32> to vector<1x1x1xf32>
      %309 = vector.extract %308[0, 0, 0] : f32 from vector<1x1x1xf32>
      %310 = vector.broadcast %309 : f32 to vector<1x1xf32>
      %311 = vector.broadcast %310 : vector<1x1xf32> to vector<1x384xf32>
      %312 = arith.cmpf oeq, %290, %311 : vector<1x384xf32>
      %cst_201 = arith.constant 0xFF800000 : f32
      %313 = vector.broadcast %cst_201 : f32 to vector<1x1xf32>
      %314 = arith.cmpf ogt, %301, %313 : vector<1x1xf32>
      %cst_202 = arith.constant 0.000000e+00 : f32
      %315 = vector.broadcast %cst_202 : f32 to vector<1x384xf32>
      %316 = arith.select %312, %282, %315 : vector<1x384xi1>, vector<1x384xf32>
      %317 = vector.shape_cast %316 : vector<1x384xf32> to vector<1x1x384xf32>
      %cst_203 = arith.constant dense<0.000000e+00> : vector<1xf32>
      %318 = vector.multi_reduction <add>, %317, %cst_203 [1, 2] : vector<1x1x384xf32> to vector<1xf32>
      %319 = vector.shape_cast %318 : vector<1xf32> to vector<1x1x1xf32>
      %320 = vector.extract %319[0, 0, 0] : f32 from vector<1x1x1xf32>
      %321 = vector.broadcast %320 : f32 to vector<1x1xf32>
      %cst_204 = arith.constant 0.000000e+00 : f32
      %322 = vector.broadcast %cst_204 : f32 to vector<1x384xf32>
      %323 = arith.select %312, %283, %322 : vector<1x384xi1>, vector<1x384xf32>
      %324 = vector.shape_cast %323 : vector<1x384xf32> to vector<1x1x384xf32>
      %cst_205 = arith.constant dense<0.000000e+00> : vector<1xf32>
      %325 = vector.multi_reduction <add>, %324, %cst_205 [1, 2] : vector<1x1x384xf32> to vector<1xf32>
      %326 = vector.shape_cast %325 : vector<1xf32> to vector<1x1x1xf32>
      %327 = vector.extract %326[0, 0, 0] : f32 from vector<1x1x1xf32>
      %328 = vector.broadcast %327 : f32 to vector<1x1xf32>
      %cst_206 = arith.constant 0.000000e+00 : f32
      %329 = vector.broadcast %cst_206 : f32 to vector<1x384xf32>
      %330 = arith.select %312, %284, %329 : vector<1x384xi1>, vector<1x384xf32>
      %331 = vector.shape_cast %330 : vector<1x384xf32> to vector<1x1x384xf32>
      %cst_207 = arith.constant dense<0.000000e+00> : vector<1xf32>
      %332 = vector.multi_reduction <add>, %331, %cst_207 [1, 2] : vector<1x1x384xf32> to vector<1xf32>
      %333 = vector.shape_cast %332 : vector<1xf32> to vector<1x1x1xf32>
      %334 = vector.extract %333[0, 0, 0] : f32 from vector<1x1x1xf32>
      %335 = vector.broadcast %334 : f32 to vector<1x1xf32>
      %cst_208 = arith.constant 0.000000e+00 : f32
      %336 = vector.broadcast %cst_208 : f32 to vector<1x384xf32>
      %337 = arith.select %312, %285, %336 : vector<1x384xi1>, vector<1x384xf32>
      %338 = vector.shape_cast %337 : vector<1x384xf32> to vector<1x1x384xf32>
      %cst_209 = arith.constant dense<0.000000e+00> : vector<1xf32>
      %339 = vector.multi_reduction <add>, %338, %cst_209 [1, 2] : vector<1x1x384xf32> to vector<1xf32>
      %340 = vector.shape_cast %339 : vector<1xf32> to vector<1x1x1xf32>
      %341 = vector.extract %340[0, 0, 0] : f32 from vector<1x1x1xf32>
      %342 = vector.broadcast %341 : f32 to vector<1x1xf32>
      %cst_210 = arith.constant 0.000000e+00 : f32
      %343 = vector.broadcast %cst_210 : f32 to vector<1x384xf32>
      %344 = arith.select %312, %280, %343 : vector<1x384xi1>, vector<1x384xf32>
      %345 = vector.shape_cast %344 : vector<1x384xf32> to vector<1x1x384xf32>
      %cst_211 = arith.constant dense<0.000000e+00> : vector<1xf32>
      %346 = vector.multi_reduction <add>, %345, %cst_211 [1, 2] : vector<1x1x384xf32> to vector<1xf32>
      %347 = vector.shape_cast %346 : vector<1xf32> to vector<1x1x1xf32>
      %348 = vector.extract %347[0, 0, 0] : f32 from vector<1x1x1xf32>
      %349 = vector.broadcast %348 : f32 to vector<1x1xf32>
      %cst_212 = arith.constant 0.000000e+00 : f32
      %350 = vector.broadcast %cst_212 : f32 to vector<1x384xf32>
      %351 = arith.select %312, %281, %350 : vector<1x384xi1>, vector<1x384xf32>
      %352 = vector.shape_cast %351 : vector<1x384xf32> to vector<1x1x384xf32>
      %cst_213 = arith.constant dense<0.000000e+00> : vector<1xf32>
      %353 = vector.multi_reduction <add>, %352, %cst_213 [1, 2] : vector<1x1x384xf32> to vector<1xf32>
      %354 = vector.shape_cast %353 : vector<1xf32> to vector<1x1x1xf32>
      %355 = vector.extract %354[0, 0, 0] : f32 from vector<1x1x1xf32>
      %356 = vector.broadcast %355 : f32 to vector<1x1xf32>
      %357 = arith.subf %335, %321 : vector<1x1xf32>
      %358 = arith.subf %342, %328 : vector<1x1xf32>
      %359 = arith.mulf %357, %358 : vector<1x1xf32>
      %360 = vector.broadcast %321 : vector<1x1xf32> to vector<1x384xf32>
      %361 = arith.maximumf %360, %282 : vector<1x384xf32>
      %362 = vector.broadcast %328 : vector<1x1xf32> to vector<1x384xf32>
      %363 = arith.maximumf %362, %283 : vector<1x384xf32>
      %364 = vector.broadcast %335 : vector<1x1xf32> to vector<1x384xf32>
      %365 = arith.minimumf %364, %284 : vector<1x384xf32>
      %366 = vector.broadcast %342 : vector<1x1xf32> to vector<1x384xf32>
      %367 = arith.minimumf %366, %285 : vector<1x384xf32>
      %368 = arith.subf %365, %361 : vector<1x384xf32>
      %cst_214 = arith.constant 0.000000e+00 : f32
      %369 = vector.broadcast %cst_214 : f32 to vector<1x384xf32>
      %370 = arith.maximumf %368, %369 : vector<1x384xf32>
      %371 = arith.subf %367, %363 : vector<1x384xf32>
      %cst_215 = arith.constant 0.000000e+00 : f32
      %372 = vector.broadcast %cst_215 : f32 to vector<1x384xf32>
      %373 = arith.maximumf %371, %372 : vector<1x384xf32>
      %374 = arith.mulf %370, %373 : vector<1x384xf32>
      %375 = vector.broadcast %359 : vector<1x1xf32> to vector<1x384xf32>
      %376 = arith.addf %375, %288 : vector<1x384xf32>
      %377 = arith.subf %376, %374 : vector<1x384xf32>
      %cst_216 = arith.constant 9.99999971E-10 : f32
      %378 = vector.broadcast %cst_216 : f32 to vector<1x384xf32>
      %379 = arith.maximumf %377, %378 : vector<1x384xf32>
      %380 = arith.divf %374, %379 : vector<1x384xf32>
      %381 = vector.broadcast %349 : vector<1x1xf32> to vector<1x384xf32>
      %382 = arith.cmpf oeq, %280, %381 : vector<1x384xf32>
      %383 = vector.broadcast %356 : vector<1x1xf32> to vector<1x384xf32>
      %384 = arith.cmpf oeq, %281, %383 : vector<1x384xf32>
      %385 = arith.andi %382, %384 : vector<1x384xi1>
      %cst_217 = arith.constant 5.000000e-01 : f32
      %386 = vector.broadcast %cst_217 : f32 to vector<1x384xf32>
      %387 = arith.cmpf oge, %380, %386 : vector<1x384xf32>
      %388 = arith.andi %387, %385 : vector<1x384xi1>
      %389 = arith.ori %388, %312 : vector<1x384xi1>
      %390 = vector.broadcast %314 : vector<1x1xi1> to vector<1x384xi1>
      %391 = arith.andi %390, %389 : vector<1x384xi1>
      %cst_218 = arith.constant 0xFF800000 : f32
      %392 = vector.broadcast %cst_218 : f32 to vector<1x384xf32>
      %393 = arith.select %391, %392, %arg11 : vector<1x384xi1>, vector<1x384xf32>
      %c0_i32_219 = arith.constant 0 : i32
      %394 = vector.broadcast %c0_i32_219 : i32 to vector<16x8xi32>
      %395 = arith.cmpi eq, %291, %394 : vector<16x8xi32>
      %cst_220 = arith.constant 0.000000e+00 : f32
      %396 = vector.shape_cast %356 : vector<1x1xf32> to vector<1x1xf32>
      %397 = vector.broadcast %396 : vector<1x1xf32> to vector<16x8xf32>
      %398 = vector.broadcast %cst_220 : f32 to vector<16x8xf32>
      %399 = arith.select %395, %397, %398 : vector<16x8xi1>, vector<16x8xf32>
      %c1_i32_221 = arith.constant 1 : i32
      %400 = vector.broadcast %c1_i32_221 : i32 to vector<16x8xi32>
      %401 = arith.cmpi eq, %291, %400 : vector<16x8xi32>
      %cst_222 = arith.constant 0.000000e+00 : f32
      %402 = vector.shape_cast %321 : vector<1x1xf32> to vector<1x1xf32>
      %403 = vector.broadcast %402 : vector<1x1xf32> to vector<16x8xf32>
      %404 = vector.broadcast %cst_222 : f32 to vector<16x8xf32>
      %405 = arith.select %401, %403, %404 : vector<16x8xi1>, vector<16x8xf32>
      %406 = arith.addf %399, %405 : vector<16x8xf32>
      %c2_i32 = arith.constant 2 : i32
      %407 = vector.broadcast %c2_i32 : i32 to vector<16x8xi32>
      %408 = arith.cmpi eq, %291, %407 : vector<16x8xi32>
      %cst_223 = arith.constant 0.000000e+00 : f32
      %409 = vector.shape_cast %328 : vector<1x1xf32> to vector<1x1xf32>
      %410 = vector.broadcast %409 : vector<1x1xf32> to vector<16x8xf32>
      %411 = vector.broadcast %cst_223 : f32 to vector<16x8xf32>
      %412 = arith.select %408, %410, %411 : vector<16x8xi1>, vector<16x8xf32>
      %413 = arith.addf %406, %412 : vector<16x8xf32>
      %c3_i32 = arith.constant 3 : i32
      %414 = vector.broadcast %c3_i32 : i32 to vector<16x8xi32>
      %415 = arith.cmpi eq, %291, %414 : vector<16x8xi32>
      %cst_224 = arith.constant 0.000000e+00 : f32
      %416 = vector.shape_cast %335 : vector<1x1xf32> to vector<1x1xf32>
      %417 = vector.broadcast %416 : vector<1x1xf32> to vector<16x8xf32>
      %418 = vector.broadcast %cst_224 : f32 to vector<16x8xf32>
      %419 = arith.select %415, %417, %418 : vector<16x8xi1>, vector<16x8xf32>
      %420 = arith.addf %413, %419 : vector<16x8xf32>
      %c4_i32 = arith.constant 4 : i32
      %421 = vector.broadcast %c4_i32 : i32 to vector<16x8xi32>
      %422 = arith.cmpi eq, %291, %421 : vector<16x8xi32>
      %cst_225 = arith.constant 0.000000e+00 : f32
      %423 = vector.shape_cast %342 : vector<1x1xf32> to vector<1x1xf32>
      %424 = vector.broadcast %423 : vector<1x1xf32> to vector<16x8xf32>
      %425 = vector.broadcast %cst_225 : f32 to vector<16x8xf32>
      %426 = arith.select %422, %424, %425 : vector<16x8xi1>, vector<16x8xf32>
      %427 = arith.addf %420, %426 : vector<16x8xf32>
      %c5_i32 = arith.constant 5 : i32
      %428 = vector.broadcast %c5_i32 : i32 to vector<16x8xi32>
      %429 = arith.cmpi eq, %291, %428 : vector<16x8xi32>
      %cst_226 = arith.constant 0.000000e+00 : f32
      %430 = vector.shape_cast %301 : vector<1x1xf32> to vector<1x1xf32>
      %431 = vector.broadcast %430 : vector<1x1xf32> to vector<16x8xf32>
      %432 = vector.broadcast %cst_226 : f32 to vector<16x8xf32>
      %433 = arith.select %429, %431, %432 : vector<16x8xi1>, vector<16x8xf32>
      %434 = arith.addf %427, %433 : vector<16x8xf32>
      %c6_i32 = arith.constant 6 : i32
      %435 = vector.broadcast %c6_i32 : i32 to vector<16x8xi32>
      %436 = arith.cmpi eq, %291, %435 : vector<16x8xi32>
      %cst_227 = arith.constant 0.000000e+00 : f32
      %437 = vector.shape_cast %349 : vector<1x1xf32> to vector<1x1xf32>
      %438 = vector.broadcast %437 : vector<1x1xf32> to vector<16x8xf32>
      %439 = vector.broadcast %cst_227 : f32 to vector<16x8xf32>
      %440 = arith.select %436, %438, %439 : vector<16x8xi1>, vector<16x8xf32>
      %441 = arith.addf %434, %440 : vector<16x8xf32>
      %cst_228 = arith.constant -1.000000e+00 : f32
      %442 = vector.broadcast %cst_228 : f32 to vector<16x8xf32>
      %443 = vector.shape_cast %314 : vector<1x1xi1> to vector<1x1xi1>
      %444 = vector.broadcast %443 : vector<1x1xi1> to vector<16x8xi1>
      %445 = arith.select %444, %441, %442 : vector<16x8xi1>, vector<16x8xf32>
      %446 = vector.broadcast %arg10 : i32 to vector<16x8xi32>
      %447 = arith.cmpi eq, %292, %446 : vector<16x8xi32>
      %448 = arith.select %447, %445, %arg12 : vector<16x8xi1>, vector<16x8xf32>
      scf.yield %393, %448 : vector<1x384xf32>, vector<16x8xf32>
    }
    %c16_i32_195 = arith.constant 16 : i32
    %c0_196 = arith.constant 0 : index
    %c0_197 = arith.constant 0 : index
    %296 = vector.load %arg8[%c0_196, %c0_197] : memref<16x8xf32, #tpu.memory_space<vmem>>, vector<16x8xf32>
    tpu.vector_store %arg8[%c0_196, %c0_197], %295#1 {strides = array<i32>} : memref<16x8xf32, #tpu.memory_space<vmem>>, vector<16x8xf32>,
    return
  }
  func.func @transform_0(%arg0: i32) -> (i32, i32) {
    %c0_i32 = arith.constant 0 : i32
    %c0_i32_0 = arith.constant 0 : i32
    %c0_i32_1 = arith.constant 0 : i32
    return %c0_i32, %c0_i32_0 : i32, i32
  }
  func.func @transform_1(%arg0: i32) -> (i32, i32) {
    %c0_i32 = arith.constant 0 : i32
    %c0_i32_0 = arith.constant 0 : i32
    %c0_i32_1 = arith.constant 0 : i32
    return %c0_i32, %c0_i32_0 : i32, i32
  }
  func.func @transform_2(%arg0: i32) -> (i32, i32) {
    %c0_i32 = arith.constant 0 : i32
    %c0_i32_0 = arith.constant 0 : i32
    %c0_i32_1 = arith.constant 0 : i32
    return %c0_i32, %c0_i32_0 : i32, i32
  }
  func.func @transform_3(%arg0: i32) -> (i32, i32) {
    %c0_i32 = arith.constant 0 : i32
    %c0_i32_0 = arith.constant 0 : i32
    %c0_i32_1 = arith.constant 0 : i32
    return %c0_i32, %c0_i32_0 : i32, i32
  }
  func.func @transform_4(%arg0: i32) -> (i32, i32) {
    %c0_i32 = arith.constant 0 : i32
    %c0_i32_0 = arith.constant 0 : i32
    %c0_i32_1 = arith.constant 0 : i32
    return %c0_i32, %c0_i32_0 : i32, i32
  }
  func.func @transform_5(%arg0: i32) -> (i32, i32) {
    %c0_i32 = arith.constant 0 : i32
    %c0_i32_0 = arith.constant 0 : i32
    %c0_i32_1 = arith.constant 0 : i32
    return %c0_i32, %c0_i32_0 : i32, i32
  }
  func.func @transform_6(%arg0: i32) -> (i32, i32) {
    %c0_i32 = arith.constant 0 : i32
    %c0_i32_0 = arith.constant 0 : i32
    %c0_i32_1 = arith.constant 0 : i32
    return %c0_i32, %c0_i32_0 : i32, i32
  }
  func.func @transform_7(%arg0: i32) -> (i32, i32) {
    %c0_i32 = arith.constant 0 : i32
    %c0_i32_0 = arith.constant 0 : i32
    %c0_i32_1 = arith.constant 0 : i32
    return %c0_i32, %c0_i32_0 : i32, i32
  }
}

</mosaic_0001>

<bundles_post_ra>
// kernel: wrapper_forward.1
= control target key start
LH: loop header
LB: loop body
LE: loop exit
PB: predicated region body
PF: predicated region fallthrough
CT: control target
= control target key end

     0   :  { %v221_v0 = vlaneseq  ;;  %vm39_vm0 = vcmask 1043456   ;;  %v1070_v2 = vmov 0.0   ;;  %v1071_v6 = vmov 0   ;;  %s1527_s0 = inlined_call_operand.vmem [shape: f32[4,160], index: 0, kind: input, shape index: {}]   ;;  %s1528_s7 = inlined_call_operand.vmem [shape: f32[16,8], index: 7, kind: output, shape index: {1}]   ;;  %s1529_s1 = inlined_call_operand.vmem [shape: f32[8,4], index: 1, kind: input, shape index: {}]   ;;  %s1530_s2 = inlined_call_operand.vmem [shape: f32[8,1], index: 2, kind: input, shape index: {}]   ;;  %s1531_s4 = inlined_call_operand.vmem [shape: f32[14,1], index: 4, kind: input, shape index: {}]   ;;  %s1532_s3 = inlined_call_operand.vmem [shape: f32[14,8], index: 3, kind: input, shape index: {}]   ;;  %s1533_s6 = inlined_call_operand.vmem [shape: f32[14,160], index: 6, kind: output, shape index: {0}]   ;;  %s1534_s5 = inlined_call_operand.vmem [shape: f32[2,160], index: 5, kind: input, shape index: {}]  }
   0x1   :  { %v26_v1 = vld [vmem:[%s1527_s0] sm:$0xff]  ;;  %108 = vmatprep.mubr.f32.mxu0 %v1070_v2  ;;  %202 = vmatprep.mubr.f32.mxu1 %v1070_v2  ;;  %vm35_vm1 = vcmask 31744   ;;  %v120_v11 = vld [vmem:[%s1531_s4 + $0x8] sm:$0x3f]  ;;  %vm131_vm3 = vcmask 64512   ;;  %vm395_vm4 = vcmask 253952  }
   0x2   :  { %v27_v3 = vld [vmem:[%s1530_s2] sm:$0xff]  ;;  %v34_v4 = vcombine.high %v26_v1, %v26_v1  ;;  %v1121_v5 = vshrl.u32 %v221_v0, 7  ;;  %1001 = vset.pattern.permute.xlu0 %v1071_v6  ;;  %1002 = vset.pattern.permute.xlu1 %v1071_v6  ;;  %v118_v20 = vld [vmem:[%s1532_s3 + $0x8] sm:$0x3f]  ;;  %v1146_v21 = vand.u32 127, %v221_v0  ;;  %vm216_vm5 = vcmask 261120  }
   0x3   :  { %v25_v7 = vld [vmem:[%s1529_s1] sm:$0xff]  ;;  %30 = vperm.xlu0 %1001, %v27_v3   ;;  %128 = vperm.xlu1 %1002, %v120_v11   ;;  %vm219_vm6 = vcmask 259072   ;;  %vm242_vm7 = vcmask 1042432   ;;  %vm416_vm8 = vcmask 259075   ;;  %vm298_vm9 = vcmask 1045507  }
   0x4   :  { %943 = vmatprep.subr.msk.mxu0 %vm39_vm0, %v34_v4  ;;  %vm223_vm2 = vcmp.eq.s32.totalorder %v1121_v5, 0  ;;  %v1129_v8 = vadd.s32 8, %v1121_v5  ;;  %v119_v9 = vld [vmem:[%s1531_s4] sm:$0xff]  ;;  %v1149_v22 = vcvt.s32.f32 %v1146_v21  ;;  %v1157_v26 = vadd.s32 128, %v1146_v21 }
   0x5   :  { %944 = vmatpush1.msk.msra.mxu0 %vm39_vm0, %v26_v1  ;;  %v224_v10 = vsel %vm223_vm2, -inf, %v1070_v2  ;;  %v117_v19 = vld [vmem:[%s1532_s3] sm:$0xff]  ;;  %v1160_v27 = vadd.s32 256, %v1146_v21  ;;  %vm360_vm12 = vcmask 256000  }
   0x6   :  { %225 = vst [vmem:[#allocation2] sm:$0xff] %v224_v10  ;;  %226 = vst [vmem:[#allocation2 + $0x8] sm:$0xff] %v224_v10  ;;  %945 = vmatmul.mubr.msk.f32.vlgmr.msra.gmra.mxu0 %vm35_vm1, %v25_v7  ;;  %v1152_v23 = vmul.f32 0.0625, %v1149_v22  ;;  %v231_v24 = vmul.f32 0.015625, %v1149_v22  ;;  %v527_v29 = vcvt.s32.f32 %v1157_v26 }
   0x7   :  { %227 = vst [vmem:[#allocation2 + $0x10] sm:$0xff] %v224_v10  ;;  %123 = vperm.xlu0 %1001, %v119_v9   ;;  %v528_v30 = vcvt.s32.f32 %v1160_v27 }
   0x8   :  { %v350_v25 = vfloor.f32 %v1152_v23  ;;  %v232_v28 = vfloor.f32 %v231_v24  ;;  %v233_v24 = vld [vmem:[%s1534_s5] sm:$0x1] }
   0xa   :  { %398 = vst.msk [vmem:[#allocation2 + $0x12] sm:$0x1] %vm395_vm4, %v350_v25  ;;  %280 = vst [vmem:[#allocation2 + $0x2] sm:$0x1] %v232_v28 }
   0xb   :  { %338 = vst [vmem:[#allocation2 + $0xa] sm:$0x1] %v232_v28 }
  0x7e   :  { %v31_v13 = vpop.permute.xlu0 %30  ;;  %v129_v35 = vpop.permute.xlu1 %128 }
  0x82   :  { %v124_v31 = vpop.permute.xlu0 %123 }
  0xc6   :  { %v110_v12 = vpop.f32.mrf.mxu0 }
  0xc7   :  { %v111_v14 = vadd.f32 %v110_v12, %v31_v13 }
  0xc8   :  { %v112_v15 = vpop.f32.mrf.mxu0 }
  0xc9   :  { %v113_v16 = vadd.f32 %v112_v15, %v31_v13  ;;  %v115_v18 = vmax.f32 %v111_v14, 0.0 }
  0xcb   :  { %v116_v17 = vmax.f32 %v113_v16, 0.0 }
  0xcd   :  { %168 = vmatprep.subr.mxu1 %v116_v17 }
  0xce   :  { %169 = vmatpush1.msra.mxu1 %v115_v18 }
  0xcf   :  { %946 = vmatmul.mubr.msk.f32.vlgmr.msra.gmra.mxu1 %vm131_vm3, %v117_v19 }
  0xd0   :  { %208 = vmatprep.mubr.f32.mxu1 %v1070_v2 }
  0xd3   :  { %947 = vmatmul.mubr.msk.f32.gmra.mxu1 %vm131_vm3, %v118_v20 }
 0x18f   :  { %v204_v32 = vpop.f32.mrf.mxu1 }
 0x190   :  { %v205_v33 = vadd.f32 %v204_v32, %v124_v31 }
 0x191   :  { %v206_v34 = vpop.f32.mrf.mxu1 }
 0x192   :  { %215 = vst [vmem:[%s1533_s6] sm:$0xff] %v205_v33  ;;  %v207_v36 = vadd.f32 %v206_v34, %v124_v31 }
 0x193   :  { %v210_v37 = vpop.f32.mrf.mxu1 }
 0x194   :  { %217 = vst.msk [vmem:[%s1533_s6 + $0x8] sm:$0xff] %vm216_vm5, %v207_v36  ;;  %v211_v38 = vadd.f32 %v210_v37, %v129_v35  ;;  %v234_v36 = vld [vmem:[%s1534_s5 + $0x1] sm:$0x1]  ;;  %vm455_vm5 = vcmask 516352  }
 0x195   :  { %v212_v39 = vpop.f32.mrf.mxu1 }
 0x196   :  { %218 = vst [vmem:[%s1533_s6 + $0x10] sm:$0x3f] %v211_v38  ;;  %v213_v40 = vadd.f32 %v212_v39, %v129_v35 }
 0x198   :  { %220 = vst.msk [vmem:[%s1533_s6 + $0x18] sm:$0x3f] %vm219_vm6, %v213_v40  ;;  %v352_v40 = vld [vmem:[%s1534_s5 + $0x3] sm:$0x1] }
 0x199   :  { %v235_v41 = vld [vmem:[%s1533_s6] sm:$0x7]  ;;  %v291_v54 = vld [vmem:[%s1533_s6] sm:$0x38]  ;;  %v261_v14 = vld [vmem:[%s1533_s6 + $0x6] ss:$0 sm:$0xff] }
 0x19a   :  { %v236_v42 = vsub.f32 0.0, %v235_v41  ;;  %v292_v3 = vsub.f32 0.0, %v291_v54  ;;  %v262_v18 = vld [vmem:[%s1533_s6 + $0x7] ss:$0 sm:$0xff]  ;;  %v265_v20 = vmul.f32 2.0, %v261_v14 }
 0x19b   :  { %v409_v57 = vld [vmem:[%s1533_s6 + $0x8] sm:$0x38]  ;;  %v353_v63 = vld [vmem:[%s1533_s6 + $0x8] sm:$0x7]  ;;  %v267_v33 = vmul.f32 2.0, %v262_v18 }
 0x19c   :  { %v237_v43 = vmul.f32 1.442695, %v236_v42  ;;  %v410_v2 = vsub.f32 0.0, %v409_v57  ;;  %v293_v10 = vmul.f32 1.442695, %v292_v3  ;;  %v354_v11 = vsub.f32 0.0, %v353_v63 }
 0x19d   :  { %v263_v44 = vld [vmem:[%s1533_s6 + $0x10] ss:$0 sm:$0xff]  ;;  %v264_v45 = vld [vmem:[%s1533_s6 + $0x11] ss:$0 sm:$0xff]  ;;  %v321_v51 = vld [vmem:[%s1533_s6 + $0x14] ss:$0 sm:$0xff]  ;;  %v266_v41 = vadd.f32 %v265_v20, %v233_v24 }
 0x19e   :  { %1004 = vpow2.f32 %v237_v43  ;;  %v269_v46 = vmin.f32 %v263_v44, 4.1351666  ;;  %v273_v47 = vmin.f32 %v264_v45, 4.1351666  ;;  %v322_v53 = vld [vmem:[%s1533_s6 + $0x15] ss:$0 sm:$0xff] }
 0x19f   :  { %v437_v48 = vld [vmem:[%s1533_s6 + $0x1d] ss:$0 sm:$0xff]  ;;  %v436_v56 = vld [vmem:[%s1533_s6 + $0x1c] ss:$0 sm:$0xff]  ;;  %v327_v58 = vmin.f32 %v321_v51, 4.1351666 }
 0x1a0   :  { %v446_v49 = vmin.f32 %v437_v48, 4.1351666  ;;  %v270_v50 = vmul.f32 1.442695, %v269_v46  ;;  %v274_v52 = vmul.f32 1.442695, %v273_v47 }
 0x1a1   :  { %v331_v59 = vmin.f32 %v322_v53, 4.1351666  ;;  %v381_v60 = vld [vmem:[%s1533_s6 + $0x19] ss:$0 sm:$0xff]  ;;  %v442_v61 = vmin.f32 %v436_v56, 4.1351666 }
 0x1a2   :  { %v447_v55 = vmul.f32 1.442695, %v446_v49  ;;  %1006 = vpow2.f32 %v270_v50  ;;  %v380_v62 = vld [vmem:[%s1533_s6 + $0x18] ss:$0 sm:$0xff]  ;;  %v328_v0 = vmul.f32 1.442695, %v327_v58  ;;  %v268_v49 = vadd.f32 %v267_v33, %v234_v36 }
 0x1a3   :  { %1008 = vpow2.f32 %v274_v52  ;;  %v332_v1 = vmul.f32 1.442695, %v331_v59  ;;  %v443_v4 = vmul.f32 1.442695, %v442_v61  ;;  %v390_v6 = vmin.f32 %v381_v60, 4.1351666 }
 0x1a4   :  { %1010 = vpow2.f32 %v447_v55  ;;  %v386_v7 = vmin.f32 %v380_v62, 4.1351666  ;;  %v411_v9 = vmul.f32 1.442695, %v410_v2  ;;  %v435_v16 = vld [vmem:[%s1533_s6 + $0x1b] ss:$0 sm:$0xff] }
 0x1a5   :  { %1012 = vpow2.f32 %v328_v0  ;;  %v391_v12 = vmul.f32 1.442695, %v390_v6  ;;  %v355_v17 = vmul.f32 1.442695, %v354_v11  ;;  %v440_v28 = vmul.f32 6.0, %v435_v16 }
 0x1a6   :  { %1014 = vpow2.f32 %v332_v1  ;;  %v387_v13 = vmul.f32 1.442695, %v386_v7  ;;  %v319_v31 = vld [vmem:[%s1533_s6 + $0x12] ss:$0 sm:$0xff]  ;;  %v320_v34 = vld [vmem:[%s1533_s6 + $0x13] ss:$0 sm:$0xff] }
 0x1a7   :  { %1016 = vpow2.f32 %v443_v4  ;;  %v434_v38 = vld [vmem:[%s1533_s6 + $0x1a] ss:$0 sm:$0xff]  ;;  %v323_v43 = vmul.f32 3.0, %v319_v31  ;;  %v441_v44 = vadd.f32 %v440_v28, %v352_v40  ;;  %v325_v47 = vmul.f32 3.0, %v320_v34  ;;  %v379_v51 = vld [vmem:[%s1533_s6 + $0xf] ss:$0 sm:$0xff] }
 0x1a8   :  { %1018 = vpow2.f32 %v411_v9  ;;  %v1243_v48 = vsub.s32 0, %v1121_v5  ;;  %v438_v52 = vmul.f32 6.0, %v434_v38  ;;  %v378_v57 = vld [vmem:[%s1533_s6 + $0xe] ss:$0 sm:$0xff]  ;;  %v384_v3 = vmul.f32 4.0, %v379_v51  ;;  %s1313_s6 = smov 0  }
 0x1a9   :  { %1020 = vpow2.f32 %v293_v10  ;;  %v324_v61 = vadd.f32 %v323_v43, %v233_v24  ;;  %v326_v1 = vadd.f32 %v325_v47, %v234_v36  ;;  %v351_v4 = vld [vmem:[%s1534_s5 + $0x2] sm:$0x1]  ;;  %v382_v11 = vmul.f32 4.0, %v378_v57  ;;  %s1072_s5 = smov 32  }
 0x1aa   :  { %1022 = vpow2.f32 %v391_v12  ;;  %v439_v9 = vadd.f32 %v438_v52, %v351_v4 }
 0x1ab   :  { %v1005_v15 = vpop.eup %1004  ;;  %1024 = vpow2.f32 %v387_v13 }
 0x1ac   :  { %v239_v19 = vadd.f32 1.0, %v1005_v15 }
 0x1ae   :  { %1026 = vrcp.f32 %v239_v19 }
 0x1af   :  { %v1007_v32 = vpop.eup %1006  ;;  %1028 = vpow2.f32 %v355_v17 }
 0x1b0   :  { %v1009_v35 = vpop.eup %1008  ;;  %v272_v37 = vmul.f32 2.0, %v1007_v32 }
 0x1b1   :  { %v1011_v39 = vpop.eup %1010  ;;  %v276_v42 = vmul.f32 2.0, %v1009_v35  ;;  %v385_v35 = vadd.f32 %v384_v3, %v352_v40 }
 0x1b2   :  { %v449_v45 = vmul.f32 6.0, %v1011_v39  ;;  %v281_v46 = vmul.f32 0.5, %v272_v37  ;;  %v1013_v53 = vpop.eup %1012  ;;  %v383_v39 = vadd.f32 %v382_v11, %v351_v4 }
 0x1b3   :  { %v284_v50 = vmul.f32 0.5, %v276_v42  ;;  %v1015_v58 = vpop.eup %1014  ;;  %v330_v62 = vmul.f32 3.0, %v1013_v53 }
 0x1b4   :  { %v478_v54 = vmul.f32 0.5, %v449_v45  ;;  %v282_v55 = vsub.f32 %v266_v41, %v281_v46  ;;  %v287_v56 = vadd.f32 %v281_v46, %v266_v41  ;;  %v1017_v63 = vpop.eup %1016  ;;  %v334_v2 = vmul.f32 3.0, %v1015_v58 }
 0x1b5   :  { %v285_v59 = vsub.f32 %v268_v49, %v284_v50  ;;  %v289_v60 = vadd.f32 %v284_v50, %v268_v49  ;;  %v1019_v6 = vpop.eup %1018  ;;  %v339_v7 = vmul.f32 0.5, %v330_v62  ;;  %v445_v10 = vmul.f32 6.0, %v1017_v63 }
 0x1b6   :  { %v479_v0 = vsub.f32 %v441_v44, %v478_v54  ;;  %283 = vst [vmem:[#allocation2 + $0x3] sm:$0x1] %v282_v55  ;;  %288 = vst [vmem:[#allocation2 + $0x5] sm:$0x1] %v287_v56  ;;  %v1021_v12 = vpop.eup %1020  ;;  %v342_v14 = vmul.f32 0.5, %v334_v2  ;;  %v499_v15 = vadd.f32 %v478_v54, %v441_v44  ;;  %v413_v16 = vadd.f32 1.0, %v1019_v6 }
 0x1b7   :  { %286 = vst [vmem:[#allocation2 + $0x4] sm:$0x1] %v285_v59  ;;  %290 = vst [vmem:[#allocation2 + $0x6] sm:$0x1] %v289_v60  ;;  %v1023_v17 = vpop.eup %1022  ;;  %v340_v18 = vsub.f32 %v324_v61, %v339_v7  ;;  %v345_v19 = vadd.f32 %v339_v7, %v324_v61  ;;  %v467_v20 = vmul.f32 0.5, %v445_v10  ;;  %v295_v24 = vadd.f32 1.0, %v1021_v12 }
 0x1b8   :  { %v484_v13 = vrot.slane %v479_v0, %v1243_v48  ;;  %v1025_v28 = vpop.eup %1024  ;;  %v343_v31 = vsub.f32 %v326_v1, %v342_v14  ;;  %v347_v32 = vadd.f32 %v342_v14, %v326_v1  ;;  %1030 = vrcp.f32 %v413_v16 }
 0x1b9   :  { %v393_v33 = vmul.f32 4.0, %v1023_v17  ;;  %341 = vst [vmem:[#allocation2 + $0xb] sm:$0x1] %v340_v18  ;;  %346 = vst [vmem:[#allocation2 + $0xd] sm:$0x1] %v345_v19  ;;  %v468_v36 = vsub.f32 %v439_v9, %v467_v20  ;;  %1032 = vrcp.f32 %v295_v24  ;;  %v389_v37 = vmul.f32 4.0, %v1025_v28 }
 0x1ba   :  { %485 = vrot.lane.b32.xlu0 %v484_v13, %s1072_s5  ;;  %344 = vst [vmem:[#allocation2 + $0xc] sm:$0x1] %v343_v31  ;;  %348 = vst [vmem:[#allocation2 + $0xe] sm:$0x1] %v347_v32  ;;  %v504_v41 = vrot.slane %v499_v15, %v1243_v48  ;;  %v489_v45 = vadd.f32 %v467_v20, %v439_v9  ;;  %v251_v62 = vcvt.s32.f32 %v1121_v5 }
 0x1bb   :  { %v1027_v34 = vpop.eup %1026  ;;  %v402_v43 = vmul.f32 0.5, %v393_v33  ;;  %v473_v44 = vrot.slane %v468_v36, %v1243_v48  ;;  %v399_v47 = vmul.f32 0.5, %v389_v37 }
 0x1bc   :  { %v1029_v38 = vpop.eup %1028  ;;  %v243_v42 = vsel %vm242_vm7, %v1027_v34, -inf  ;;  %v494_v54 = vrot.slane %v489_v45, %v1243_v48  ;;  %v309_v33 = vrot.slane %v251_v62, 5 }
 0x1bd   :  { %v244_v46 = vrot.slane %v243_v42, 4  ;;  %v403_v40 = vsub.f32 %v385_v35, %v402_v43  ;;  %v407_v49 = vadd.f32 %v402_v43, %v385_v35  ;;  %v357_v50 = vadd.f32 1.0, %v1029_v38  ;;  %474 = vrot.lane.b32.xlu1 %v473_v44, %s1072_s5 }
 0x1be   :  { %505 = vrot.lane.b32.xlu0 %v504_v41, %s1072_s5  ;;  %v400_v52 = vsub.f32 %v383_v39, %v399_v47  ;;  %v405_v53 = vadd.f32 %v399_v47, %v383_v39 }
 0x1bf   :  { %v245_v51 = vmax.f32 %v243_v42, %v244_v46  ;;  %404 = vst.msk [vmem:[#allocation2 + $0x14] sm:$0x1] %vm395_vm4, %v403_v40  ;;  %408 = vst.msk [vmem:[#allocation2 + $0x16] sm:$0x1] %vm395_vm4, %v407_v49  ;;  %1034 = vrcp.f32 %v357_v50 }
 0x1c0   :  { %401 = vst.msk [vmem:[#allocation2 + $0x13] sm:$0x1] %vm395_vm4, %v400_v52  ;;  %406 = vst.msk [vmem:[#allocation2 + $0x15] sm:$0x1] %vm395_vm4, %v405_v53 }
 0x1c1   :  { %v246_v55 = vrot.slane %v245_v51, 2  ;;  %495 = vrot.lane.b32.xlu1 %v494_v54, %s1072_s5 }
 0x1c3   :  { %v247_v56 = vmax.f32 %v245_v51, %v246_v55 }
 0x1c5   :  { %v248_v57 = vrot.slane %v247_v56, 1  ;;  %v1031_v58 = vpop.eup %1030 }
 0x1c6   :  { %v1033_v60 = vpop.eup %1032  ;;  %v417_v61 = vsel %vm416_vm8, %v1031_v58, -inf }
 0x1c7   :  { %v249_v59 = vmax.f32 %v247_v56, %v248_v57  ;;  %v418_v63 = vrot.slane %v417_v61, 4  ;;  %v299_v0 = vsel %vm298_vm9, %v1033_v60, -inf }
 0x1c8   :  { %v300_v3 = vrot.slane %v299_v0, 4 }
 0x1c9   :  { %vm250_vm10 = vcmp.ge.f32.partialorder %v249_v59, 0.3  ;;  %vm252_vm11 = vcmp.eq.f32.partialorder %v1027_v34, %v249_v59  ;;  %v419_v4 = vmax.f32 %v417_v61, %v418_v63 }
 0x1ca   :  { %v253_v1 = vsel %vm252_vm11, %v251_v62, 3.0  ;;  %v277_v2 = vsel %vm250_vm10, %v249_v59, -inf  ;;  %v301_v9 = vmax.f32 %v299_v0, %v300_v3 }
 0x1cb   :  { %v254_v6 = vsel %vm242_vm7, %v253_v1, inf  ;;  %278 = vst [vmem:[#allocation2] sm:$0x1] %v277_v2  ;;  %v420_v11 = vrot.slane %v419_v4, 2 }
 0x1cc   :  { %v255_v7 = vrot.slane %v254_v6, 4  ;;  %v1035_v10 = vpop.eup %1034  ;;  %v302_v13 = vrot.slane %v301_v9, 2 }
 0x1cd   :  { %v361_v14 = vsel %vm360_vm12, %v1035_v10, -inf  ;;  %v421_v15 = vmax.f32 %v419_v4, %v420_v11 }
 0x1ce   :  { %v256_v12 = vmin.f32 %v254_v6, %v255_v7  ;;  %v362_v16 = vrot.slane %v361_v14, 4  ;;  %v303_v18 = vmax.f32 %v301_v9, %v302_v13 }
 0x1cf   :  { %v422_v19 = vrot.slane %v421_v15, 1 }
 0x1d0   :  { %v257_v17 = vrot.slane %v256_v12, 2  ;;  %v363_v20 = vmax.f32 %v361_v14, %v362_v16  ;;  %v304_v28 = vrot.slane %v303_v18, 1 }
 0x1d1   :  { %v423_v31 = vmax.f32 %v421_v15, %v422_v19 }
 0x1d2   :  { %v258_v24 = vmin.f32 %v256_v12, %v257_v17  ;;  %v364_v32 = vrot.slane %v363_v20, 2  ;;  %v305_v35 = vmax.f32 %v303_v18, %v304_v28  ;;  %v1309_v28 = vmov -1.0  }
 0x1d3   :  { %vm424_vm13 = vcmp.ge.f32.partialorder %v423_v31, 0.3  ;;  %vm425_vm14 = vcmp.eq.f32.partialorder %v1031_v58, %v423_v31 }
 0x1d4   :  { %v259_v34 = vrot.slane %v258_v24, 1  ;;  %v365_v36 = vmax.f32 %v363_v20, %v364_v32  ;;  %v450_v37 = vsel %vm424_vm13, %v423_v31, -inf  ;;  %v426_v38 = vsel %vm425_vm14, %v309_v33, 3.0 }
 0x1d5   :  { %vm306_vm15 = vcmp.ge.f32.partialorder %v305_v35, 0.3  ;;  %452 = vrot.lane.b32.xlu1 %v450_v37, %s1072_s5  ;;  %v427_v41 = vsel %vm416_vm8, %v426_v38, inf  ;;  %vm307_vm0 = vcmp.eq.f32.partialorder %v1033_v60, %v305_v35 }
 0x1d6   :  { %v260_v39 = vmin.f32 %v258_v24, %v259_v34  ;;  %v335_v42 = vsel %vm306_vm15, %v305_v35, -inf  ;;  %v366_v43 = vrot.slane %v365_v36, 1  ;;  %v428_v44 = vrot.slane %v427_v41, 4 }
 0x1d7   :  { %v311_v45 = vsel %vm307_vm0, %v309_v33, 3.0  ;;  %336 = vst [vmem:[#allocation2 + $0x8] sm:$0x1] %v335_v42  ;;  %v1307_v24 = vmov -1.0  }
 0x1d8   :  { %279 = vst [vmem:[#allocation2 + $0x1] sm:$0x1] %v260_v39  ;;  %v312_v46 = vsel %vm298_vm9, %v311_v45, inf  ;;  %v367_v47 = vmax.f32 %v365_v36, %v366_v43  ;;  %v429_v40 = vmin.f32 %v427_v41, %v428_v44 }
 0x1d9   :  { %v313_v49 = vrot.slane %v312_v46, 4  ;;  %463 = vrot.lane.b32.xlu1 %v350_v25, %s1072_s5 }
 0x1da   :  { %vm368_vm1 = vcmp.ge.f32.partialorder %v367_v47, 0.3  ;;  %vm369_vm2 = vcmp.eq.f32.partialorder %v1035_v10, %v367_v47  ;;  %v430_v50 = vrot.slane %v429_v40, 2 }
 0x1db   :  { %v314_v51 = vmin.f32 %v312_v46, %v313_v49  ;;  %v394_v52 = vsel %vm368_vm1, %v367_v47, -inf  ;;  %v370_v53 = vsel %vm369_vm2, %v251_v62, 3.0 }
 0x1dc   :  { %396 = vst.msk [vmem:[#allocation2 + $0x10] sm:$0x1] %vm395_vm4, %v394_v52  ;;  %v371_v54 = vsel %vm360_vm12, %v370_v53, inf  ;;  %v431_v55 = vmin.f32 %v429_v40, %v430_v50 }
 0x1dd   :  { %v315_v56 = vrot.slane %v314_v51, 2  ;;  %v372_v57 = vrot.slane %v371_v54, 4 }
 0x1de   :  { %v432_v58 = vrot.slane %v431_v55, 1 }
 0x1df   :  { %v316_v59 = vmin.f32 %v314_v51, %v315_v56  ;;  %v373_v60 = vmin.f32 %v371_v54, %v372_v57 }
 0x1e0   :  { %v433_v61 = vmin.f32 %v431_v55, %v432_v58 }
 0x1e1   :  { %v317_v63 = vrot.slane %v316_v59, 1  ;;  %v374_v23 = vrot.slane %v373_v60, 2 }
 0x1e2   :  { %458 = vrot.lane.b32.xlu0 %v433_v61, %s1072_s5 }
 0x1e3   :  { %v318_v25 = vmin.f32 %v316_v59, %v317_v63  ;;  %v375_v0 = vmin.f32 %v373_v60, %v374_v23 }
 0x1e5   :  { %337 = vst [vmem:[#allocation2 + $0x9] sm:$0x1] %v318_v25  ;;  %v376_v1 = vrot.slane %v375_v0, 1 }
 0x1e7   :  { %v377_v62 = vmin.f32 %v375_v0, %v376_v1 }
 0x1e9   :  { %397 = vst.msk [vmem:[#allocation2 + $0x11] sm:$0x1] %vm395_vm4, %v377_v62 }
 0x22c   :  { %v486_v2 = vpop.permute.xlu0 %485 }
 0x22d   :  { %488 = vst.msk [vmem:[#allocation2 + $0x14] sm:$0x1] %vm455_vm5, %v486_v2 }
 0x22f   :  { %v475_v4 = vpop.permute.xlu1 %474 }
 0x230   :  { %v506_v3 = vpop.permute.xlu0 %505  ;;  %477 = vst.msk [vmem:[#allocation2 + $0x13] sm:$0x1] %vm455_vm5, %v475_v4 }
 0x231   :  { %508 = vst.msk [vmem:[#allocation2 + $0x16] sm:$0x1] %vm455_vm5, %v506_v3 }
 0x233   :  { %v496_v6 = vpop.permute.xlu1 %495 }
 0x234   :  { %498 = vst.msk [vmem:[#allocation2 + $0x15] sm:$0x1] %vm455_vm5, %v496_v6  ;;  %v1288_v9 = vld [vmem:[#allocation2 + $0x4] ss:$8 sm:$0x7] }
 0x237   :  { %v1292_v11 = vld [vmem:[#allocation2 + $0x3] ss:$8 sm:$0x7] }
 0x238   :  { %v1286_v7 = vld [vmem:[#allocation2 + $0x6] ss:$8 sm:$0x7] }
 0x239   :  { %v523_v10 = vsub.f32 %v1286_v7, %v1288_v9 }
 0x23b   :  { %v1294_v12 = vld [vmem:[#allocation2 + $0x5] ss:$8 sm:$0x7] }
 0x23c   :  { %v522_v13 = vsub.f32 %v1294_v12, %v1292_v11 }
 0x23e   :  { %v1298_v14 = vmul.f32 %v523_v10, %v522_v13 }
 0x247   :  { %v453_v15 = vpop.permute.xlu1 %452 }
 0x248   :  { %456 = vst.msk [vmem:[#allocation2 + $0x10] sm:$0x1] %vm455_vm5, %v453_v15 }
 0x24b   :  { %v464_v16 = vpop.permute.xlu1 %463 }
 0x24c   :  { %466 = vst.msk [vmem:[#allocation2 + $0x12] sm:$0x1] %vm455_vm5, %v464_v16 }
 0x24f   :  { %v509_v17 = vld [vmem:[#allocation2] ss:$8 sm:$0x7]  }
 0x253   :  { %v1302_v18 = vld [vmem:[#allocation2 + $0x2] ss:$8 sm:$0x7] }
 0x254   :  { %v459_v19 = vpop.permute.xlu0 %458 }
 0x255   :  { %461 = vst.msk [vmem:[#allocation2 + $0x11] sm:$0x1] %vm455_vm5, %v459_v19 }
 0x25c   :  { %v1305_v20 = vld [vmem:[#allocation2 + $0x1] ss:$8 sm:$0x7] }
 0x25d LB: > { %v1328_v31 = vsub.s32 1, %v1121_v5  ;;  %v1331_v32 = vsub.s32 2, %v1121_v5  ;;  %vm555_vm4 = vcmask 1040384   ;;  %v543_v33 = vrot.slane %v1064_v17, %v1243_v48  ;;  %s1068_s6 = sphi %s1313_s6, %s535_s6   ;;  %v1064_v17 = vphi %v509_v17, %v892_v17   ;;  %v1060_v28 = vphi %v1309_v28, %v1542_v28   ;;  %v1056_v24 = vphi %v1307_v24, %v1541_v24  }
 0x25e   : > { %v1073_v49 = vmov 1966171168   ;;  %v575_v52 = vcombine.low %v1149_v22, %v527_v29  ;;  %v707_v16 = vrot.slane %v1294_v12, %v1243_v48  ;;  %vm893_vm10 = vcmp.eq.s32.totalorder %v1146_v21, 0 }
 0x25f   : > { %v547_v34 = vrot.slane %v1064_v17, %v1328_v31  ;;  %v551_v35 = vrot.slane %v1064_v17, %v1331_v32  ;;  %v556_v36 = vsel %vm555_vm4, %v543_v33, -inf  ;;  %v577_v50 = vunpack.c.l.s4 %v1073_v49 }
 0x260   : > { %v711_v19 = vrot.slane %v1294_v12, %v1328_v31  ;;  %v715_v33 = vrot.slane %v1294_v12, %v1331_v32  ;;  %vm895_vm11 = vcmp.eq.s32.totalorder %v1146_v21, 1  ;;  %vm898_vm12 = vcmp.eq.s32.totalorder %v1146_v21, 2 }
 0x261   : > { %v557_v37 = vsel %vm555_vm4, %v547_v34, -inf  ;;  %v558_v38 = vsel %vm555_vm4, %v551_v35, -inf  ;;  %v578_v51 = vunpack.c.0.s8 %v577_v50  ;;  %v639_v34 = vrot.slane %v1292_v11, %v1243_v48 }
 0x262   : > { %v559_v39 = vmax.f32 %v556_v36, %v557_v37  ;;  %v643_v35 = vrot.slane %v1292_v11, %v1328_v31  ;;  %v647_v36 = vrot.slane %v1292_v11, %v1331_v32  ;;  %v775_v37 = vrot.slane %v1305_v20, %v1243_v48 }
 0x263   : > { %v1346_v53 = vsub.s32 %v578_v51, %v1121_v5  ;;  %v808_v51 = vrot.slane %v1302_v18, %v1243_v48  ;;  %vm901_vm13 = vcmp.eq.s32.totalorder %v1146_v21, 3  ;;  %vm904_vm14 = vcmp.eq.s32.totalorder %v1146_v21, 4 }
 0x264   : > { %v560_v41 = vmax.f32 %v559_v39, %v558_v38  ;;  %v779_v38 = vrot.slane %v1305_v20, %v1328_v31  ;;  %v783_v39 = vrot.slane %v1305_v20, %v1331_v32  ;;  %vm907_vm15 = vcmp.eq.s32.totalorder %v1146_v21, 5 }
 0x265   : > { %v582_v54 = vrot.slane %v575_v52, %v1346_v53  ;;  %v589_v55 = vrot.slane %v528_v30, %v1346_v53  ;;  %vm910_vm0 = vcmp.eq.s32.totalorder %v1146_v21, 6 }
 0x266   : > { %561 = vmax.xlane.f32.xlu0 %v560_v41  ;;  %v673_v41 = vrot.slane %v1288_v9, %v1243_v48 }
 0x267   : > { %v590_v56 = vcombine.low %v582_v54, %v589_v55 }
 0x269   : > { %v597_v57 = vrot.slane %v590_v56, %v1346_v53 }
 0x2ef   : > { %v562_v42 = vpop.xlane.xlu0 %561 }
 0x2f0   : > { %v563_v43 = vrot.slane %v562_v42, 4 }
 0x2f2   : > { %v564_v44 = vmax.f32 %v562_v42, %v563_v43  ;;  %v677_v42 = vrot.slane %v1288_v9, %v1328_v31  ;;  %v681_v43 = vrot.slane %v1288_v9, %v1331_v32 }
 0x2f4   : > { %v565_v45 = vrot.slane %v564_v44, 2 }
 0x2f6   : > { %v566_v46 = vmax.f32 %v564_v44, %v565_v45  ;;  %v741_v45 = vrot.slane %v1286_v7, %v1243_v48 }
 0x2f8   : > { %v567_v47 = vrot.slane %v566_v46, 1 }
 0x2fa   : > { %v568_v40 = vmax.f32 %v566_v46, %v567_v47  ;;  %v745_v46 = vrot.slane %v1286_v7, %v1328_v31  ;;  %v749_v47 = vrot.slane %v1286_v7, %v1331_v32 }
 0x2fc   : > { %948 = vpush %v568_v40 }
 0x32d   : > { %s949_s3 = spop %948 }
 0x32e   : > { %v1353_v58 = vstv %s949_s3 }
 0x32f   : > { %vm571_vm6 = vcmp.eq.f32.partialorder %v1064_v17, %v1353_v58  ;;  %vm634_vm5 = vcmp.gt.f32.partialorder %v1353_v58, -inf }
 0x330   : > { %v599_v59 = vsel %vm571_vm6, %v597_v57, 384.0 }
 0x331   : > { %v604_v60 = vrot.slane %v599_v59, %v1243_v48  ;;  %v608_v61 = vrot.slane %v599_v59, %v1328_v31  ;;  %v612_v63 = vrot.slane %v599_v59, %v1331_v32 }
 0x333   : > { %v616_v23 = vsel %vm555_vm4, %v604_v60, inf  ;;  %v617_v25 = vsel %vm555_vm4, %v608_v61, inf  ;;  %v618_v1 = vsel %vm555_vm4, %v612_v63, inf }
 0x334   : > { %v619_v0 = vmin.f32 %v616_v23, %v617_v25 }
 0x336   : > { %v620_v62 = vmin.f32 %v619_v0, %v618_v1 }
 0x338   : > { %621 = vmin.xlane.f32.xlu0 %v620_v62 }
 0x3c1   : > { %v622_v2 = vpop.xlane.xlu0 %621 }
 0x3c2   : > { %v623_v3 = vrot.slane %v622_v2, 4 }
 0x3c4   : > { %v624_v4 = vmin.f32 %v622_v2, %v623_v3 }
 0x3c6   : > { %v625_v6 = vrot.slane %v624_v4, 2 }
 0x3c8   : > { %v626_v10 = vmin.f32 %v624_v4, %v625_v6 }
 0x3ca   : > { %v627_v13 = vrot.slane %v626_v10, 1 }
 0x3cc   : > { %v628_v15 = vmin.f32 %v626_v10, %v627_v13 }
 0x3ce   : > { %950 = vpush %v628_v15 }
 0x3ff   : > { %s951_s11 = spop %950 }
 0x400   : > { %v630_v44 = vstv %s951_s11 }
 0x401   : > { %vm1394_vm7 = vcmp.eq.f32.partialorder %v1149_v22, %v630_v44  ;;  %vm1400_vm8 = vcmp.eq.f32.partialorder %v527_v29, %v630_v44  ;;  %vm1406_vm9 = vcmp.eq.f32.partialorder %v528_v30, %v630_v44 }
 0x402   : > { %v719_v52 = vsel %vm1394_vm7, %v707_v16, 0.0  ;;  %v720_v54 = vsel %vm1400_vm8, %v711_v19, 0.0  ;;  %v721_v55 = vsel %vm1406_vm9, %v715_v33, 0.0  ;;  %v651_v56 = vsel %vm1394_vm7, %v639_v34, 0.0 }
 0x403   : > { %v722_v57 = vsel %vm555_vm4, %v719_v52, 0.0  ;;  %v723_v59 = vsel %vm555_vm4, %v720_v54, 0.0  ;;  %v725_v60 = vsel %vm555_vm4, %v721_v55, 0.0  ;;  %v652_v61 = vsel %vm1400_vm8, %v643_v35, 0.0 }
 0x404   : > { %v724_v63 = vadd.f32 %v723_v59, %v722_v57  ;;  %v653_v23 = vsel %vm1406_vm9, %v647_v36, 0.0  ;;  %v654_v25 = vsel %vm555_vm4, %v651_v56, 0.0  ;;  %v655_v0 = vsel %vm555_vm4, %v652_v61, 0.0 }
 0x405   : > { %v656_v1 = vadd.f32 %v655_v0, %v654_v25  ;;  %v657_v62 = vsel %vm555_vm4, %v653_v23, 0.0  ;;  %v787_v2 = vsel %vm1394_vm7, %v775_v37, 0.0  ;;  %v788_v3 = vsel %vm1400_vm8, %v779_v38, 0.0 }
 0x406   : > { %v726_v4 = vadd.f32 %v725_v60, %v724_v63  ;;  %v789_v6 = vsel %vm1406_vm9, %v783_v39, 0.0  ;;  %v790_v10 = vsel %vm555_vm4, %v787_v2, 0.0  ;;  %v791_v13 = vsel %vm555_vm4, %v788_v3, 0.0 }
 0x407   : > { %v658_v15 = vadd.f32 %v657_v62, %v656_v1  ;;  %v792_v16 = vadd.f32 %v791_v13, %v790_v10  ;;  %v685_v19 = vsel %vm1394_vm7, %v673_v41, 0.0  ;;  %v812_v33 = vrot.slane %v1302_v18, %v1328_v31 }
 0x408   : > { %727 = vadd.xlane.f32.xlu0 %v726_v4  ;;  %v686_v34 = vsel %vm1400_vm8, %v677_v42, 0.0  ;;  %v687_v35 = vsel %vm1406_vm9, %v681_v43, 0.0  ;;  %v688_v36 = vsel %vm555_vm4, %v685_v19, 0.0  ;;  %v753_v37 = vsel %vm1394_vm7, %v741_v45, 0.0 }
 0x409   : > { %659 = vadd.xlane.f32.xlu1 %v658_v15  ;;  %v793_v38 = vsel %vm555_vm4, %v789_v6, 0.0  ;;  %v689_v39 = vsel %vm555_vm4, %v686_v34, 0.0  ;;  %v754_v31 = vsel %vm1400_vm8, %v745_v46, 0.0  ;;  %v756_v42 = vsel %vm555_vm4, %v753_v37, 0.0 }
 0x40a   : > { %v794_v41 = vadd.f32 %v793_v38, %v792_v16  ;;  %v690_v44 = vadd.f32 %v689_v39, %v688_v36  ;;  %v757_v52 = vsel %vm555_vm4, %v754_v31, 0.0  ;;  %v691_v43 = vsel %vm555_vm4, %v687_v35, 0.0 }
 0x40b   : > { %v820_v54 = vsel %vm1394_vm7, %v808_v51, 0.0  ;;  %v821_v45 = vsel %vm1400_vm8, %v812_v33, 0.0  ;;  %v755_v56 = vsel %vm1406_vm9, %v749_v47, 0.0  ;;  %v758_v46 = vadd.f32 %v757_v52, %v756_v42 }
 0x40c   : > { %795 = vadd.xlane.f32.xlu0 %v794_v41  ;;  %v692_v55 = vadd.f32 %v691_v43, %v690_v44  ;;  %v816_v57 = vrot.slane %v1302_v18, %v1331_v32  ;;  %v823_v59 = vsel %vm555_vm4, %v820_v54, 0.0  ;;  %v824_v60 = vsel %vm555_vm4, %v821_v45, 0.0 }
 0x40d   : > { %v1074_v61 = vmov 0   ;;  %v759_v47 = vsel %vm555_vm4, %v755_v56, 0.0  ;;  %v825_v1 = vadd.f32 %v824_v60, %v823_v59 }
 0x40e   : > { %v861_v51 = vsel %vm1394_vm7, 1, %v1074_v61  ;;  %693 = vadd.xlane.f32.xlu1 %v692_v55  ;;  %v862_v63 = vsel %vm1400_vm8, 1, %v1074_v61  ;;  %v863_v23 = vsel %vm1406_vm9, 1, %v1074_v61  ;;  %v760_v0 = vadd.f32 %v759_v47, %v758_v46 }
 0x40f   : > { %v864_v25 = vcombine.low %v861_v51, %v862_v63  ;;  %v822_v32 = vsel %vm1406_vm9, %v816_v57, 0.0  ;;  %v878_v40 = vrot.slane %v863_v23, %v1346_v53 }
 0x410   : > { %v826_v2 = vsel %vm555_vm4, %v822_v32, 0.0 }
 0x411   : > { %v871_v62 = vrot.slane %v864_v25, %v1346_v53  ;;  %v827_v3 = vadd.f32 %v826_v2, %v825_v1 }
 0x412   : > { %761 = vadd.xlane.f32.xlu1 %v760_v0 }
 0x413   : > { %v1478_v49 = vcombine.low %v871_v62, %v878_v40 }
 0x416   : > { %828 = vadd.xlane.f32.xlu1 %v827_v3 }
 0x491   : > { %v728_v4 = vpop.xlane.xlu0 %727 }
 0x492   : > { %v729_v6 = vrot.slane %v728_v4, 4  ;;  %v660_v10 = vpop.xlane.xlu1 %659 }
 0x493   : > { %v661_v13 = vrot.slane %v660_v10, 4 }
 0x494   : > { %v730_v15 = vadd.f32 %v729_v6, %v728_v4 }
 0x495   : > { %v662_v16 = vadd.f32 %v661_v13, %v660_v10  ;;  %v796_v50 = vpop.xlane.xlu0 %795 }
 0x496   : > { %v797_v19 = vrot.slane %v796_v50, 4  ;;  %v731_v33 = vrot.slane %v730_v15, 2 }
 0x497   : > { %v663_v34 = vrot.slane %v662_v16, 2  ;;  %v694_v35 = vpop.xlane.xlu1 %693 }
 0x498   : > { %v798_v36 = vadd.f32 %v797_v19, %v796_v50  ;;  %v695_v37 = vrot.slane %v694_v35, 4  ;;  %v732_v42 = vadd.f32 %v731_v33, %v730_v15 }
 0x499   : > { %v664_v38 = vadd.f32 %v663_v34, %v662_v16 }
 0x49a   : > { %v696_v39 = vadd.f32 %v695_v37, %v694_v35  ;;  %v799_v31 = vrot.slane %v798_v36, 2  ;;  %v733_v57 = vrot.slane %v732_v42, 1 }
 0x49b   : > { %v762_v41 = vpop.xlane.xlu1 %761  ;;  %v665_v44 = vrot.slane %v664_v38, 1 }
 0x49c   : > { %v697_v52 = vrot.slane %v696_v39, 2  ;;  %v763_v43 = vrot.slane %v762_v41, 4  ;;  %v800_v56 = vadd.f32 %v799_v31, %v798_v36  ;;  %v734_v47 = vadd.f32 %v733_v57, %v732_v42 }
 0x49d   : > { %v666_v54 = vadd.f32 %v665_v44, %v664_v38 }
 0x49e   : > { %v764_v45 = vadd.f32 %v763_v43, %v762_v41  ;;  %v698_v55 = vadd.f32 %v697_v52, %v696_v39  ;;  %v801_v25 = vrot.slane %v800_v56, 1 }
 0x49f   : > { %v829_v46 = vpop.xlane.xlu1 %828  ;;  %952 = vpush %v666_v54 }
 0x4a0   : > { %v765_v59 = vrot.slane %v764_v45, 2  ;;  %v830_v60 = vrot.slane %v829_v46, 4  ;;  %v699_v61 = vrot.slane %v698_v55, 1  ;;  %v802_v40 = vadd.f32 %v801_v25, %v800_v56 }
 0x4a2   : > { %v831_v51 = vadd.f32 %v830_v60, %v829_v46  ;;  %v700_v63 = vadd.f32 %v699_v61, %v698_v55  ;;  %v766_v23 = vadd.f32 %v765_v59, %v764_v45 }
 0x4a4   : > { %v832_v0 = vrot.slane %v831_v51, 2  ;;  %954 = vpush %v700_v63  ;;  %v767_v32 = vrot.slane %v766_v23, 1  ;;  %v914_v63 = vstv %s1068_s6  ;;  %s535_s6 = sadd.s32 1, %s1068_s6  }
 0x4a5   : > { %956 = vpush %v734_v47  ;;  %vm915_vm1 = vcmp.eq.s32.totalorder %v1121_v5, %v914_v63  ;;  %vm916_vm2 = vcmp.eq.s32.totalorder %v1129_v8, %v914_v63  ;;  %p532_p0 = scmp.ge.s32.totalorder %s535_s6, 16  }
 0x4a6   : > { %v833_v1 = vadd.f32 %v832_v0, %v831_v51  ;;  %v768_v62 = vadd.f32 %v767_v32, %v766_v23  ;;  %v908_v51 = vsel %vm907_vm15, %v1353_v58, 0.0 }
 0x4a8   : > { %958 = vpush %v768_v62  ;;  %v834_v2 = vrot.slane %v833_v1, 1 }
 0x4a9   : > { %960 = vpush %v802_v40  ;;  %v886_v40 = vrot.slane %v1478_v49, %v1346_v53 }
 0x4aa   : > { %v835_v3 = vadd.f32 %v834_v2, %v833_v1 }
 0x4ac   : > { %962 = vpush %v835_v3 }
 0x4d0   : > { %s953_s12 = spop %952 }
 0x4d1   : > { %v668_v4 = vstv %s953_s12 }
 0x4d2   : > { %v840_v15 = vmax.f32 %v668_v4, %v1292_v11  ;;  %v896_v44 = vsel %vm895_vm11, %v668_v4, 0.0 }
 0x4d5   : > { %s955_s13 = spop %954 }
 0x4d6   : > { %s957_s14 = spop %956  ;;  %v702_v6 = vstv %s955_s13 }
 0x4d7   : > { %v736_v10 = vstv %s957_s14  ;;  %v841_v16 = vmax.f32 %v702_v6, %v1288_v9  ;;  %v899_v52 = vsel %vm898_vm12, %v702_v6, 0.0 }
 0x4d8   : > { %v842_v13 = vmin.f32 %v736_v10, %v1294_v12  ;;  %v837_v19 = vsub.f32 %v736_v10, %v668_v4  ;;  %v902_v55 = vsel %vm901_vm13, %v736_v10, 0.0 }
 0x4d9   : > { %s959_s15 = spop %958 }
 0x4da   : > { %v770_v50 = vstv %s959_s15  ;;  %v844_v33 = vsub.f32 %v842_v13, %v840_v15  ;;  %s1484_s16 = spop %960 }
 0x4db   : > { %v838_v34 = vsub.f32 %v770_v50, %v702_v6  ;;  %v843_v35 = vmin.f32 %v770_v50, %v1286_v7  ;;  %v905_v57 = vsel %vm904_vm14, %v770_v50, 0.0  ;;  %v854_v60 = vstv %s1484_s16 }
 0x4dc   : > { %v845_v39 = vmax.f32 %v844_v33, 0.0  ;;  %v911_v47 = vsel %vm910_vm0, %v854_v60, 0.0  ;;  %vm855_vm6 = vcmp.eq.f32.partialorder %v1305_v20, %v854_v60 }
 0x4dd   : > { %v839_v36 = vmul.f32 %v838_v34, %v837_v19  ;;  %v846_v37 = vsub.f32 %v843_v35, %v841_v16  ;;  %s1488_s17 = spop %962 }
 0x4de   : > { %v856_v38 = vstv %s1488_s17 }
 0x4df   : > { %v847_v31 = vmax.f32 %v846_v37, 0.0  ;;  %v894_v41 = vsel %vm893_vm10, %v856_v38, 0.0  ;;  %v849_v43 = vadd.f32 %v839_v36, %v1298_v14  ;;  %vm857_vm4 = vcmp.eq.f32.partialorder %v1302_v18, %v856_v38 }
 0x4e0   : > { %v897_v42 = vadd.f32 %v896_v44, %v894_v41  ;;  %vm858_vm7 = vmand %vm855_vm6, %vm857_vm4  ;;  %vm887_vm10 = vcmp.ne.s32.totalorder %v886_v40, 0 }
 0x4e1   : > { %v848_v54 = vmul.f32 %v847_v31, %v845_v39 }
 0x4e2   : > { %v900_v45 = vadd.f32 %v899_v52, %v897_v42 }
 0x4e3   : > { %v850_v56 = vsub.f32 %v849_v43, %v848_v54 }
 0x4e4   : > { %v903_v46 = vadd.f32 %v902_v55, %v900_v45 }
 0x4e5   : > { %v851_v59 = vmax.f32 %v850_v56, 1e-09 }
 0x4e6   : > { %v906_v61 = vadd.f32 %v905_v57, %v903_v46 }
 0x4e7   : > { %1036 = vrcp.f32 %v851_v59 }
 0x4e8   : > { %v909_v23 = vadd.f32 %v908_v51, %v906_v61 }
 0x4ea   : > { %v912_v25 = vadd.f32 %v911_v47, %v909_v23 }
 0x4ec   : > { %v913_v0 = vsel %vm634_vm5, %v912_v25, -1.0 }
 0x4ed   : > { %v917_v32 = vsel %vm915_vm1, %v913_v0, %v1060_v28   ;;  %v918_v1 = vsel %vm916_vm2, %v913_v0, %v1056_v24  }
 0x4ee   : > { %v1541_v24 = vmov %v918_v1  ;;  %v1542_v28 = vmov %v917_v32  ;;  %919 = vst.msk [vmem:[%s1528_s7] sm:$0xff] (%p532_p0), %vm131_vm3, %v917_v32  ;;  %920 = vst.msk [vmem:[%s1528_s7 + $0x8] sm:$0xff] (%p532_p0), %vm131_vm3, %v918_v1 }
 0x4f4   : > { %v1037_v62 = vpop.eup %1036 }
 0x4f5   : > { %v853_v2 = vmul.f32 %v1037_v62, %v848_v54 }
 0x4f7   : > { %vm859_vm8 = vcmp.ge.f32.partialorder %v853_v2, 0.5  ;;  %534 = sbr.rel (!%p532_p0) target bundleno = 605 (0x25d), region = 65 }
 0x4f8   : > { %vm860_vm9 = vmand %vm859_vm8, %vm858_vm7 }
 0x4f9   : > { %vm888_vm11 = vmor %vm860_vm9, %vm887_vm10 }
 0x4fa   : > { %vm891_vm12 = vmand %vm634_vm5, %vm888_vm11 }
 0x4fb   : > { %v892_v17 = vsel %vm891_vm12, -inf, %v1064_v17  }

</bundles_post_ra>
